<compile_context>
chip_gen: v7x
topology: tpu7x:2x2x1
jax: 0.10.0
libtpu: 0.0.40
codegen_flags: <defaults>
</compile_context>

<pallas_src>
import jax
import jax.numpy as jnp
from jax import lax
from jax.experimental import pallas as pl
from jax.experimental.pallas import tpu as pltpu


def graph_gru_kernel(x_ref, e0_ref, Wi3_ref, bi3_ref, Kg_ref, bg_ref,
                     KWh3_ref, bh3_ref, Wl_ref, bl_ref, out_ref, e_scratch):
    TC, B, SD = x_ref.shape            # chunk length, batch, S*D
    SH = Kg_ref.shape[1]               # S*H (128-lane aligned)
    f32 = jnp.float32

    # Initialize the recurrent carry once; it persists across T-chunks (grid steps).
    @pl.when(pl.program_id(0) == 0)
    def _():
        e_scratch[...] = e0_ref[...]

    # Time-invariant weights, loaded once per chunk.  Stored bf16 in VMEM (halved
    # residency / vld traffic); promoted to f32 here — default-precision dots round
    # to a single bf16 MXU pass either way, gate math stays f32.
    Wi3 = Wi3_ref[...].astype(f32)     # (S*D, 3*S*H)  [Wir | Wiz | Win], block-diag
    bi3 = bi3_ref[...]                 # (1, 3*S*H)
    Kg = Kg_ref[...].astype(f32)       # (EP, S*H)     kron(A_hat^T, Wg), row-padded
    bg = bg_ref[...]                   # (1, S*H)
    KWh3 = KWh3_ref[...].astype(f32)   # (EP, 3*S*H)   Kg @ [Whr|Whz|Whn], row-padded
    bh3 = bh3_ref[...]                 # (1, 3*S*H)    bg @ Wh* + bh*
    Wl = Wl_ref[...].astype(f32)       # (S*H, EP)     last Linear, col-padded
    bl = bl_ref[...]                   # (1, EP)

    # Input-gate matmul hoisted out of the recurrence: x does not depend on e, so
    # all TC steps' input gates are one (TC*B, S*D) @ (S*D, 3*S*H) matmul.
    gi_all = jnp.dot(x_ref[...].reshape(TC * B, SD), Wi3,
                     preferred_element_type=f32) + bi3
    gi_all = gi_all.reshape(TC, B, 3 * SH)

    e = e_scratch[...]                 # (B, EP) lane-padded recurrent embedding
    for t in range(TC):                # fully unrolled (TC is static & small)
        # Two *independent* dots off e (issue back-to-back on the MXU):
        h = jnp.dot(e, Kg, preferred_element_type=f32) + bg           # (B, S*H)
        gh3 = jnp.dot(e, KWh3, preferred_element_type=f32) + bh3      # (B, 3*S*H)
        gi = gi_all[t]                                                 # (B, 3*S*H)

        # torch.nn.GRUCell gate math (r, z, n), 128-lane-aligned slices.
        pre_r = gi[:, :SH] + gh3[:, :SH]
        pre_z = gi[:, SH:2 * SH] + gh3[:, SH:2 * SH]
        rz = jax.nn.sigmoid(jnp.concatenate([pre_r, pre_z], axis=0))  # one (2B,S*H) EUP slab
        r, z = rz[:B], rz[B:]
        n = jnp.tanh(gi[:, 2 * SH:] + r * gh3[:, 2 * SH:])
        h_new = (1.0 - z) * n + z * h

        # last_funcs: Linear + Tanh.  Output columns are zero-padded to EP so the
        # per-step store below is a full-128-lane unmasked vst.
        e = jnp.tanh(jnp.dot(h_new, Wl, preferred_element_type=f32) + bl)  # (B, EP)
        out_ref[t] = e

    e_scratch[...] = e                 # carry to the next T-chunk


def _block_diag(blocks):
    """(S, p, q) stack of per-node weights -> (S*p, S*q) block-diagonal matrix."""
    S, p, q = blocks.shape
    eye = jnp.eye(S, dtype=blocks.dtype)
    return jnp.einsum('spq,st->sptq', blocks, eye).reshape(S * p, S * q)


def graph_gru_forward(x, final_index, params, t_chunk=None):
    """x: (B, S, T, D) float32; final_index: (B,) int32.  Returns (eT, last)."""
    (W0, b0, A_hat, Wg, bg, WihT, WhhT, bih, bhh, Wl, bl) = params
    B, S, T, D = x.shape
    E = W0.shape[-1]
    H = Wg.shape[-1]
    SD, SH, SE = S * D, S * H, S * E
    EP = ((SE + 127) // 128) * 128     # lane-padded embedding width (unmasked stores)

    if t_chunk is None:
        t_chunk = min(T, 64)
    assert T % t_chunk == 0, "t_chunk must divide T"
    n_chunks = T // t_chunk

    f32, bf16 = jnp.float32, jnp.bfloat16
    P = lax.Precision.HIGHEST

    # emb_init (one-time Linear per node on x[..., 0, :]) — plain JAX glue.
    x0 = x[:, :, 0, :]
    e0 = jnp.einsum('bsd,sde->bse', x0, W0) + b0[None]                 # (B, S, E)
    e0_pad = jnp.zeros((B, EP), f32).at[:, :SE].set(e0.reshape(B, SE))

    # Time-major, node-flattened input lanes: (T, B, S*D).
    x_flat = jnp.transpose(x, (2, 0, 1, 3)).reshape(T, B, SD)

    # --- one-time weight packing (wrapper glue; weights are time-invariant) -----
    # graph_func (mean-aggregate + Linear) fused: h = e @ kron(A_hat^T, Wg) + bg.
    Kg = jnp.kron(A_hat.T, Wg)                                         # (SE, SH)
    bg_big = jnp.tile(bg.reshape(1, H), (1, S))                        # (1, SH)

    # Per-node GRUCell weights, gate-separated, block-diagonalized over nodes, and
    # concatenated along the output (N) dimension.
    Wir_bd = _block_diag(WihT[..., :H])
    Wiz_bd = _block_diag(WihT[..., H:2 * H])
    Win_bd = _block_diag(WihT[..., 2 * H:])
    Whr_bd = _block_diag(WhhT[..., :H])
    Whz_bd = _block_diag(WhhT[..., H:2 * H])
    Whn_bd = _block_diag(WhhT[..., 2 * H:])
    bir = bih[:, :H].reshape(1, SH)
    biz = bih[:, H:2 * H].reshape(1, SH)
    bin_ = bih[:, 2 * H:].reshape(1, SH)
    bhr = bhh[:, :H].reshape(1, SH)
    bhz = bhh[:, H:2 * H].reshape(1, SH)
    bhn = bhh[:, 2 * H:].reshape(1, SH)

    Wi3 = jnp.concatenate([Wir_bd, Wiz_bd, Win_bd], axis=1)            # (SD, 3*SH)
    bi3 = jnp.concatenate([bir, biz, bin_], axis=1)                    # (1, 3*SH)

    # Fuse the graph matmul into the hidden-gate weights:
    #   gh* = (e@Kg + bg) @ Wh* + bh* = e @ (Kg@Wh*) + (bg@Wh* + bh*).
    KWhr = jnp.dot(Kg, Whr_bd, precision=P)
    KWhz = jnp.dot(Kg, Whz_bd, precision=P)
    KWhn = jnp.dot(Kg, Whn_bd, precision=P)
    bhr_f = jnp.dot(bg_big, Whr_bd, precision=P) + bhr
    bhz_f = jnp.dot(bg_big, Whz_bd, precision=P) + bhz
    bhn_f = jnp.dot(bg_big, Whn_bd, precision=P) + bhn
    KWh3 = jnp.concatenate([KWhr, KWhz, KWhn], axis=1)                 # (SE, 3*SH)
    bh3 = jnp.concatenate([bhr_f, bhz_f, bhn_f], axis=1)               # (1, 3*SH)

    # Row-pad the e-facing weights to EP (padded e lanes are zero, so no-op rows),
    # and column-pad the last Linear so e stays a clean (B, EP) slab (tanh(0)=0).
    Kg_p = jnp.zeros((EP, SH), f32).at[:SE].set(Kg)
    KWh3_p = jnp.zeros((EP, 3 * SH), f32).at[:SE].set(KWh3)
    Wl_bd = _block_diag(Wl)                                            # (SH, SE)
    Wl_p = jnp.zeros((SH, EP), f32).at[:, :SE].set(Wl_bd)
    bl_p = jnp.zeros((1, EP), f32).at[:, :SE].set(bl.reshape(1, SE))

    # bf16 weights (halved VMEM residency / DMA); biases & activations stay f32.
    Wi3 = Wi3.astype(bf16)
    Kg_p = Kg_p.astype(bf16)
    KWh3_p = KWh3_p.astype(bf16)
    Wl_p = Wl_p.astype(bf16)

    operands = (x_flat, e0_pad, Wi3, bi3, Kg_p, bg_big, KWh3_p, bh3, Wl_p, bl_p)

    def const_spec(a):
        nd = a.ndim
        return pl.BlockSpec(a.shape, lambda c, nd=nd: (0,) * nd)

    grid_spec = pltpu.PrefetchScalarGridSpec(
        num_scalar_prefetch=0,
        grid=(n_chunks,),                               # serial T-chunks
        in_specs=[pl.BlockSpec((t_chunk, B, SD), lambda c: (c, 0, 0))]
                 + [const_spec(a) for a in operands[1:]],
        out_specs=pl.BlockSpec((t_chunk, B, EP), lambda c: (c, 0, 0)),
        scratch_shapes=[pltpu.VMEM((B, EP), f32)],      # recurrent carry e
    )

    out = pl.pallas_call(
        graph_gru_kernel,
        out_shape=jax.ShapeDtypeStruct((T, B, EP), f32),
        grid_spec=grid_spec,
        compiler_params=pltpu.CompilerParams(dimension_semantics=("arbitrary",)),
    )(*operands)

    last = out[..., :SE].reshape(T, B, S, E)

    # return (last[final_index - 1, arange(B)], {}) — the gather is glue.
    # NOTE: final_index == 0 wraps to the last step, matching torch's -1 indexing.
    eT = last[final_index - 1, jnp.arange(B)]
    return eT, last


def reference_forward(x, final_index, params):
    """Pure-JAX replica of the PyTorch GraphGRU forward (GRU branch), f32 precision."""
    (W0, b0, A_hat, Wg, bg, WihT, WhhT, bih, bhh, Wl, bl) = params
    B, S, T, D = x.shape
    H = Wg.shape[1]
    P = lax.Precision.HIGHEST
    x0 = x[:, :, 0, :]
    e = jnp.einsum('bsd,sde->bse', x0, W0, precision=P) + b0[None]
    last = []
    for t in range(T):
        agg = jnp.einsum('ij,bje->bie', A_hat, e, precision=P)
        h = jnp.einsum('bie,eh->bih', agg, Wg, precision=P) + bg.reshape(1, 1, H)
        x_t = x[:, :, t, :]
        gi = jnp.einsum('bsd,sdg->bsg', x_t, WihT, precision=P) + bih[None]
        gh = jnp.einsum('bsh,shg->bsg', h, WhhT, precision=P) + bhh[None]
        i_r, i_z, i_n = gi[..., :H], gi[..., H:2 * H], gi[..., 2 * H:]
        h_r, h_z, h_n = gh[..., :H], gh[..., H:2 * H], gh[..., 2 * H:]
        r = jax.nn.sigmoid(i_r + h_r)
        z = jax.nn.sigmoid(i_z + h_z)
        n = jnp.tanh(i_n + r * h_n)
        h_new = (1.0 - z) * n + z * h
        e = jnp.tanh(jnp.einsum('bsh,she->bse', h_new, Wl, precision=P) + bl[None])
        last.append(e)
    last = jnp.stack(last, axis=0)
    return last[final_index - 1, jnp.arange(B)], last


if __name__ == "__main__":
    # Small shapes consistent with the forward:
    #   batch B=2, num_states S=4, sequence length T=8, per-node feature D=8,
    #   emb_dim E=16, graph_output_dim H=32.
    B, S, T, D, E, H = 2, 4, 8, 8, 16, 32

    key = jax.random.PRNGKey(0)
    ks = jax.random.split(key, 12)
    scale = 0.1
    W0 = scale * jax.random.normal(ks[0], (S, D, E), jnp.float32)     # emb_init Linear
    b0 = scale * jax.random.normal(ks[1], (S, E), jnp.float32)
    Wg = scale * jax.random.normal(ks[2], (E, H), jnp.float32)        # graph_func Linear
    bg = scale * jax.random.normal(ks[3], (1, H), jnp.float32)
    WihT = scale * jax.random.normal(ks[4], (S, D, 3 * H), jnp.float32)   # GRUCell W_ih^T
    WhhT = scale * jax.random.normal(ks[5], (S, H, 3 * H), jnp.float32)   # GRUCell W_hh^T
    bih = scale * jax.random.normal(ks[6], (S, 3 * H), jnp.float32)
    bhh = scale * jax.random.normal(ks[7], (S, 3 * H), jnp.float32)
    Wl = scale * jax.random.normal(ks[8], (S, H, E), jnp.float32)     # last_funcs Linear
    bl = scale * jax.random.normal(ks[9], (S, E), jnp.float32)

    # data_edge (ring over the S state-nodes) + self loops, mean aggregation.
    edge_src = jnp.array([0, 1, 2, 3], dtype=jnp.int32)
    edge_dst = jnp.array([1, 2, 3, 0], dtype=jnp.int32)
    A = jnp.zeros((S, S), jnp.float32).at[edge_dst, edge_src].set(1.0) + jnp.eye(S)
    A_hat = A / jnp.sum(A, axis=1, keepdims=True)

    params = (W0, b0, A_hat, Wg, bg, WihT, WhhT, bih, bhh, Wl, bl)

    x = jax.random.normal(ks[10], (B, S, T, D), jnp.float32)
    final_index = jnp.array([T, 5], dtype=jnp.int32)   # max_time == T

    # t_chunk=4 -> grid=(2,) exercises the cross-chunk recurrent carry.
    fwd = jax.jit(lambda x, fi, p: graph_gru_forward(x, fi, p, t_chunk=4))
    eT, last = fwd(x, final_index, params)
    jax.block_until_ready(eT)

    ref_eT, ref_last = reference_forward(x, final_index, params)
    assert eT.shape == (B, S, E) and last.shape == (T, B, S, E)
    # Kernel uses default (single bf16 pass) MXU precision + bf16-packed weights vs a
    # HIGHEST-precision f32 reference; tolerance absorbs the rounding difference.
    assert jnp.allclose(last, ref_last, atol=2e-2, rtol=2e-2)
    assert jnp.allclose(eT, ref_eT, atol=2e-2, rtol=2e-2)

    print("KERNEL_OK")
</pallas_src>

<mosaic_0001>
module attributes {stable_mosaic.version = 11 : i64} {
  func.func @graph_gru_kernel(%arg0: i32, %arg1: memref<4x2x32xf32, #tpu.memory_space<vmem>>, %arg2: memref<2x128xf32, #tpu.memory_space<vmem>>, %arg3: memref<32x384xbf16, #tpu.memory_space<vmem>>, %arg4: memref<1x384xf32, #tpu.memory_space<vmem>>, %arg5: memref<128x128xbf16, #tpu.memory_space<vmem>>, %arg6: memref<1x128xf32, #tpu.memory_space<vmem>>, %arg7: memref<128x384xbf16, #tpu.memory_space<vmem>>, %arg8: memref<1x384xf32, #tpu.memory_space<vmem>>, %arg9: memref<128x128xbf16, #tpu.memory_space<vmem>>, %arg10: memref<1x128xf32, #tpu.memory_space<vmem>>, %arg11: memref<4x2x128xf32, #tpu.memory_space<vmem>>, %arg12: memref<2x128xf32, #tpu.memory_space<vmem>>) attributes {dimension_semantics = [#tpu.dimension_semantics<arbitrary>], iteration_bounds = array<i64: 2>, scalar_prefetch = 0 : i64, scratch_operands = 1 : i64, tpu.core_type = #tpu.core_type<tc>, window_params = [{transform_indices = @transform_0, window_bounds = array<i64: 4, 2, 32>}, {pipeline_mode = #tpu.pipeline_mode<synchronous>, transform_indices = @transform_1, window_bounds = array<i64: 2, 128>}, {pipeline_mode = #tpu.pipeline_mode<synchronous>, transform_indices = @transform_2, window_bounds = array<i64: 32, 384>}, {pipeline_mode = #tpu.pipeline_mode<synchronous>, transform_indices = @transform_3, window_bounds = array<i64: 1, 384>}, {pipeline_mode = #tpu.pipeline_mode<synchronous>, transform_indices = @transform_4, window_bounds = array<i64: 128, 128>}, {pipeline_mode = #tpu.pipeline_mode<synchronous>, transform_indices = @transform_5, window_bounds = array<i64: 1, 128>}, {pipeline_mode = #tpu.pipeline_mode<synchronous>, transform_indices = @transform_6, window_bounds = array<i64: 128, 384>}, {pipeline_mode = #tpu.pipeline_mode<synchronous>, transform_indices = @transform_7, window_bounds = array<i64: 1, 384>}, {pipeline_mode = #tpu.pipeline_mode<synchronous>, transform_indices = @transform_8, window_bounds = array<i64: 128, 128>}, {pipeline_mode = #tpu.pipeline_mode<synchronous>, transform_indices = @transform_9, window_bounds = array<i64: 1, 128>}, {transform_indices = @transform_10, window_bounds = array<i64: 4, 2, 128>}]} {
    %c0_i32 = arith.constant 0 : i32
    %0 = arith.cmpi eq, %arg0, %c0_i32 : i32
    %1 = arith.extui %0 : i1 to i32
    %c0_i32_0 = arith.constant 0 : i32
    %2 = arith.cmpi ne, %1, %c0_i32_0 : i32
    scf.if %2 {
      %c0_52 = arith.constant 0 : index
      %c0_53 = arith.constant 0 : index
      %179 = vector.load %arg2[%c0_52, %c0_53] : memref<2x128xf32, #tpu.memory_space<vmem>>, vector<2x128xf32>
      %c0_54 = arith.constant 0 : index
      %c0_55 = arith.constant 0 : index
      %180 = vector.load %arg12[%c0_54, %c0_55] : memref<2x128xf32, #tpu.memory_space<vmem>>, vector<2x128xf32>
      tpu.vector_store %arg12[%c0_54, %c0_55], %179 {strides = array<i32>} : memref<2x128xf32, #tpu.memory_space<vmem>>, vector<2x128xf32>,
    } else {
    }
    %c0 = arith.constant 0 : index
    %c0_1 = arith.constant 0 : index
    %3 = vector.load %arg3[%c0, %c0_1] : memref<32x384xbf16, #tpu.memory_space<vmem>>, vector<32x384xbf16>
    %4 = arith.extf %3 : vector<32x384xbf16> to vector<32x384xf32>
    %c0_2 = arith.constant 0 : index
    %c0_3 = arith.constant 0 : index
    %5 = vector.load %arg4[%c0_2, %c0_3] : memref<1x384xf32, #tpu.memory_space<vmem>>, vector<1x384xf32>
    %c0_4 = arith.constant 0 : index
    %c0_5 = arith.constant 0 : index
    %6 = vector.load %arg5[%c0_4, %c0_5] : memref<128x128xbf16, #tpu.memory_space<vmem>>, vector<128x128xbf16>
    %7 = arith.extf %6 : vector<128x128xbf16> to vector<128x128xf32>
    %c0_6 = arith.constant 0 : index
    %c0_7 = arith.constant 0 : index
    %8 = vector.load %arg6[%c0_6, %c0_7] : memref<1x128xf32, #tpu.memory_space<vmem>>, vector<1x128xf32>
    %c0_8 = arith.constant 0 : index
    %c0_9 = arith.constant 0 : index
    %9 = vector.load %arg7[%c0_8, %c0_9] : memref<128x384xbf16, #tpu.memory_space<vmem>>, vector<128x384xbf16>
    %10 = arith.extf %9 : vector<128x384xbf16> to vector<128x384xf32>
    %c0_10 = arith.constant 0 : index
    %c0_11 = arith.constant 0 : index
    %11 = vector.load %arg8[%c0_10, %c0_11] : memref<1x384xf32, #tpu.memory_space<vmem>>, vector<1x384xf32>
    %c0_12 = arith.constant 0 : index
    %c0_13 = arith.constant 0 : index
    %12 = vector.load %arg9[%c0_12, %c0_13] : memref<128x128xbf16, #tpu.memory_space<vmem>>, vector<128x128xbf16>
    %13 = arith.extf %12 : vector<128x128xbf16> to vector<128x128xf32>
    %c0_14 = arith.constant 0 : index
    %c0_15 = arith.constant 0 : index
    %14 = vector.load %arg10[%c0_14, %c0_15] : memref<1x128xf32, #tpu.memory_space<vmem>>, vector<1x128xf32>
    %c0_16 = arith.constant 0 : index
    %c0_17 = arith.constant 0 : index
    %c0_18 = arith.constant 0 : index
    %15 = vector.load %arg1[%c0_16, %c0_17, %c0_18] : memref<4x2x32xf32, #tpu.memory_space<vmem>>, vector<4x2x32xf32>
    %16 = vector.shape_cast %15 : vector<4x2x32xf32> to vector<8x32xf32>
    %cst = arith.constant dense<0.000000e+00> : vector<8x384xf32>
    %17 = tpu.matmul %16, %4, %cst {dimension_numbers = #tpu.dot_dimension_numbers<[1], [0], [0], [1], [0, 0, 1, 1], [], []>} : vector<8x32xf32>, vector<32x384xf32>, vector<8x384xf32> -> vector<8x384xf32>
    %18 = vector.broadcast %5 : vector<1x384xf32> to vector<8x384xf32>
    %19 = arith.addf %17, %18 : vector<8x384xf32>
    %20 = vector.shape_cast %19 : vector<8x384xf32> to vector<4x2x384xf32>
    %c0_19 = arith.constant 0 : index
    %c0_20 = arith.constant 0 : index
    %21 = vector.load %arg12[%c0_19, %c0_20] : memref<2x128xf32, #tpu.memory_space<vmem>>, vector<2x128xf32>
    %cst_21 = arith.constant dense<0.000000e+00> : vector<2x128xf32>
    %22 = tpu.matmul %21, %7, %cst_21 {dimension_numbers = #tpu.dot_dimension_numbers<[1], [0], [0], [1], [0, 0, 1, 1], [], []>} : vector<2x128xf32>, vector<128x128xf32>, vector<2x128xf32> -> vector<2x128xf32>
    %23 = vector.broadcast %8 : vector<1x128xf32> to vector<2x128xf32>
    %24 = arith.addf %22, %23 : vector<2x128xf32>
    %cst_22 = arith.constant dense<0.000000e+00> : vector<2x384xf32>
    %25 = tpu.matmul %21, %10, %cst_22 {dimension_numbers = #tpu.dot_dimension_numbers<[1], [0], [0], [1], [0, 0, 1, 1], [], []>} : vector<2x128xf32>, vector<128x384xf32>, vector<2x384xf32> -> vector<2x384xf32>
    %26 = vector.broadcast %11 : vector<1x384xf32> to vector<2x384xf32>
    %27 = arith.addf %25, %26 : vector<2x384xf32>
    %28 = vector.extract_strided_slice %20 {offsets = [0, 0, 0], sizes = [1, 2, 384], strides = [1, 1, 1]} : vector<4x2x384xf32> to vector<1x2x384xf32>
    %29 = vector.shape_cast %28 : vector<1x2x384xf32> to vector<2x384xf32>
    %30 = vector.extract_strided_slice %29 {offsets = [0, 0], sizes = [2, 128], strides = [1, 1]} : vector<2x384xf32> to vector<2x128xf32>
    %31 = vector.extract_strided_slice %27 {offsets = [0, 0], sizes = [2, 128], strides = [1, 1]} : vector<2x384xf32> to vector<2x128xf32>
    %32 = arith.addf %30, %31 : vector<2x128xf32>
    %33 = vector.extract_strided_slice %29 {offsets = [0, 128], sizes = [2, 128], strides = [1, 1]} : vector<2x384xf32> to vector<2x128xf32>
    %34 = vector.extract_strided_slice %27 {offsets = [0, 128], sizes = [2, 128], strides = [1, 1]} : vector<2x384xf32> to vector<2x128xf32>
    %35 = arith.addf %33, %34 : vector<2x128xf32>
    %36 = tpu.concatenate %32, %35 in 0 : vector<2x128xf32>, vector<2x128xf32> -> vector<4x128xf32>
    %37 = arith.negf %36 : vector<4x128xf32>
    %38 = math.exp %37 : vector<4x128xf32>
    %cst_23 = arith.constant 1.000000e+00 : f32
    %39 = vector.broadcast %cst_23 : f32 to vector<4x128xf32>
    %40 = arith.addf %39, %38 : vector<4x128xf32>
    %41 = arith.divf %39, %40 : vector<4x128xf32>
    %42 = vector.extract_strided_slice %41 {offsets = [0, 0], sizes = [2, 128], strides = [1, 1]} : vector<4x128xf32> to vector<2x128xf32>
    %43 = vector.extract_strided_slice %41 {offsets = [2, 0], sizes = [2, 128], strides = [1, 1]} : vector<4x128xf32> to vector<2x128xf32>
    %44 = vector.extract_strided_slice %29 {offsets = [0, 256], sizes = [2, 128], strides = [1, 1]} : vector<2x384xf32> to vector<2x128xf32>
    %45 = vector.extract_strided_slice %27 {offsets = [0, 256], sizes = [2, 128], strides = [1, 1]} : vector<2x384xf32> to vector<2x128xf32>
    %46 = arith.mulf %42, %45 : vector<2x128xf32>
    %47 = arith.addf %44, %46 : vector<2x128xf32>
    %48 = math.tanh %47 : vector<2x128xf32>
    %cst_24 = arith.constant 1.000000e+00 : f32
    %49 = vector.broadcast %cst_24 : f32 to vector<2x128xf32>
    %50 = arith.subf %49, %43 : vector<2x128xf32>
    %51 = arith.mulf %50, %48 : vector<2x128xf32>
    %52 = arith.mulf %43, %24 : vector<2x128xf32>
    %53 = arith.addf %51, %52 : vector<2x128xf32>
    %cst_25 = arith.constant dense<0.000000e+00> : vector<2x128xf32>
    %54 = tpu.matmul %53, %13, %cst_25 {dimension_numbers = #tpu.dot_dimension_numbers<[1], [0], [0], [1], [0, 0, 1, 1], [], []>} : vector<2x128xf32>, vector<128x128xf32>, vector<2x128xf32> -> vector<2x128xf32>
    %55 = vector.broadcast %14 : vector<1x128xf32> to vector<2x128xf32>
    %56 = arith.addf %54, %55 : vector<2x128xf32>
    %57 = math.tanh %56 : vector<2x128xf32>
    %c0_26 = arith.constant 0 : index
    %c0_27 = arith.constant 0 : index
    %c0_28 = arith.constant 0 : index
    %58 = vector.load %arg11[%c0_26, %c0_27, %c0_28] : memref<4x2x128xf32, #tpu.memory_space<vmem>>, vector<1x2x128xf32>
    %59 = vector.shape_cast %58 : vector<1x2x128xf32> to vector<2x128xf32>
    %60 = vector.shape_cast %57 : vector<2x128xf32> to vector<1x2x128xf32>
    tpu.vector_store %arg11[%c0_26, %c0_27, %c0_28], %60 {strides = array<i32>} : memref<4x2x128xf32, #tpu.memory_space<vmem>>, vector<1x2x128xf32>,
    %cst_29 = arith.constant dense<0.000000e+00> : vector<2x128xf32>
    %61 = tpu.matmul %57, %7, %cst_29 {dimension_numbers = #tpu.dot_dimension_numbers<[1], [0], [0], [1], [0, 0, 1, 1], [], []>} : vector<2x128xf32>, vector<128x128xf32>, vector<2x128xf32> -> vector<2x128xf32>
    %62 = vector.broadcast %8 : vector<1x128xf32> to vector<2x128xf32>
    %63 = arith.addf %61, %62 : vector<2x128xf32>
    %cst_30 = arith.constant dense<0.000000e+00> : vector<2x384xf32>
    %64 = tpu.matmul %57, %10, %cst_30 {dimension_numbers = #tpu.dot_dimension_numbers<[1], [0], [0], [1], [0, 0, 1, 1], [], []>} : vector<2x128xf32>, vector<128x384xf32>, vector<2x384xf32> -> vector<2x384xf32>
    %65 = vector.broadcast %11 : vector<1x384xf32> to vector<2x384xf32>
    %66 = arith.addf %64, %65 : vector<2x384xf32>
    %67 = vector.extract_strided_slice %20 {offsets = [1, 0, 0], sizes = [1, 2, 384], strides = [1, 1, 1]} : vector<4x2x384xf32> to vector<1x2x384xf32>
    %68 = vector.shape_cast %67 : vector<1x2x384xf32> to vector<2x384xf32>
    %69 = vector.extract_strided_slice %68 {offsets = [0, 0], sizes = [2, 128], strides = [1, 1]} : vector<2x384xf32> to vector<2x128xf32>
    %70 = vector.extract_strided_slice %66 {offsets = [0, 0], sizes = [2, 128], strides = [1, 1]} : vector<2x384xf32> to vector<2x128xf32>
    %71 = arith.addf %69, %70 : vector<2x128xf32>
    %72 = vector.extract_strided_slice %68 {offsets = [0, 128], sizes = [2, 128], strides = [1, 1]} : vector<2x384xf32> to vector<2x128xf32>
    %73 = vector.extract_strided_slice %66 {offsets = [0, 128], sizes = [2, 128], strides = [1, 1]} : vector<2x384xf32> to vector<2x128xf32>
    %74 = arith.addf %72, %73 : vector<2x128xf32>
    %75 = tpu.concatenate %71, %74 in 0 : vector<2x128xf32>, vector<2x128xf32> -> vector<4x128xf32>
    %76 = arith.negf %75 : vector<4x128xf32>
    %77 = math.exp %76 : vector<4x128xf32>
    %cst_31 = arith.constant 1.000000e+00 : f32
    %78 = vector.broadcast %cst_31 : f32 to vector<4x128xf32>
    %79 = arith.addf %78, %77 : vector<4x128xf32>
    %80 = arith.divf %78, %79 : vector<4x128xf32>
    %81 = vector.extract_strided_slice %80 {offsets = [0, 0], sizes = [2, 128], strides = [1, 1]} : vector<4x128xf32> to vector<2x128xf32>
    %82 = vector.extract_strided_slice %80 {offsets = [2, 0], sizes = [2, 128], strides = [1, 1]} : vector<4x128xf32> to vector<2x128xf32>
    %83 = vector.extract_strided_slice %68 {offsets = [0, 256], sizes = [2, 128], strides = [1, 1]} : vector<2x384xf32> to vector<2x128xf32>
    %84 = vector.extract_strided_slice %66 {offsets = [0, 256], sizes = [2, 128], strides = [1, 1]} : vector<2x384xf32> to vector<2x128xf32>
    %85 = arith.mulf %81, %84 : vector<2x128xf32>
    %86 = arith.addf %83, %85 : vector<2x128xf32>
    %87 = math.tanh %86 : vector<2x128xf32>
    %cst_32 = arith.constant 1.000000e+00 : f32
    %88 = vector.broadcast %cst_32 : f32 to vector<2x128xf32>
    %89 = arith.subf %88, %82 : vector<2x128xf32>
    %90 = arith.mulf %89, %87 : vector<2x128xf32>
    %91 = arith.mulf %82, %63 : vector<2x128xf32>
    %92 = arith.addf %90, %91 : vector<2x128xf32>
    %cst_33 = arith.constant dense<0.000000e+00> : vector<2x128xf32>
    %93 = tpu.matmul %92, %13, %cst_33 {dimension_numbers = #tpu.dot_dimension_numbers<[1], [0], [0], [1], [0, 0, 1, 1], [], []>} : vector<2x128xf32>, vector<128x128xf32>, vector<2x128xf32> -> vector<2x128xf32>
    %94 = vector.broadcast %14 : vector<1x128xf32> to vector<2x128xf32>
    %95 = arith.addf %93, %94 : vector<2x128xf32>
    %96 = math.tanh %95 : vector<2x128xf32>
    %c1 = arith.constant 1 : index
    %c0_34 = arith.constant 0 : index
    %c0_35 = arith.constant 0 : index
    %97 = vector.load %arg11[%c1, %c0_34, %c0_35] : memref<4x2x128xf32, #tpu.memory_space<vmem>>, vector<1x2x128xf32>
    %98 = vector.shape_cast %97 : vector<1x2x128xf32> to vector<2x128xf32>
    %99 = vector.shape_cast %96 : vector<2x128xf32> to vector<1x2x128xf32>
    tpu.vector_store %arg11[%c1, %c0_34, %c0_35], %99 {strides = array<i32>} : memref<4x2x128xf32, #tpu.memory_space<vmem>>, vector<1x2x128xf32>,
    %cst_36 = arith.constant dense<0.000000e+00> : vector<2x128xf32>
    %100 = tpu.matmul %96, %7, %cst_36 {dimension_numbers = #tpu.dot_dimension_numbers<[1], [0], [0], [1], [0, 0, 1, 1], [], []>} : vector<2x128xf32>, vector<128x128xf32>, vector<2x128xf32> -> vector<2x128xf32>
    %101 = vector.broadcast %8 : vector<1x128xf32> to vector<2x128xf32>
    %102 = arith.addf %100, %101 : vector<2x128xf32>
    %cst_37 = arith.constant dense<0.000000e+00> : vector<2x384xf32>
    %103 = tpu.matmul %96, %10, %cst_37 {dimension_numbers = #tpu.dot_dimension_numbers<[1], [0], [0], [1], [0, 0, 1, 1], [], []>} : vector<2x128xf32>, vector<128x384xf32>, vector<2x384xf32> -> vector<2x384xf32>
    %104 = vector.broadcast %11 : vector<1x384xf32> to vector<2x384xf32>
    %105 = arith.addf %103, %104 : vector<2x384xf32>
    %106 = vector.extract_strided_slice %20 {offsets = [2, 0, 0], sizes = [1, 2, 384], strides = [1, 1, 1]} : vector<4x2x384xf32> to vector<1x2x384xf32>
    %107 = vector.shape_cast %106 : vector<1x2x384xf32> to vector<2x384xf32>
    %108 = vector.extract_strided_slice %107 {offsets = [0, 0], sizes = [2, 128], strides = [1, 1]} : vector<2x384xf32> to vector<2x128xf32>
    %109 = vector.extract_strided_slice %105 {offsets = [0, 0], sizes = [2, 128], strides = [1, 1]} : vector<2x384xf32> to vector<2x128xf32>
    %110 = arith.addf %108, %109 : vector<2x128xf32>
    %111 = vector.extract_strided_slice %107 {offsets = [0, 128], sizes = [2, 128], strides = [1, 1]} : vector<2x384xf32> to vector<2x128xf32>
    %112 = vector.extract_strided_slice %105 {offsets = [0, 128], sizes = [2, 128], strides = [1, 1]} : vector<2x384xf32> to vector<2x128xf32>
    %113 = arith.addf %111, %112 : vector<2x128xf32>
    %114 = tpu.concatenate %110, %113 in 0 : vector<2x128xf32>, vector<2x128xf32> -> vector<4x128xf32>
    %115 = arith.negf %114 : vector<4x128xf32>
    %116 = math.exp %115 : vector<4x128xf32>
    %cst_38 = arith.constant 1.000000e+00 : f32
    %117 = vector.broadcast %cst_38 : f32 to vector<4x128xf32>
    %118 = arith.addf %117, %116 : vector<4x128xf32>
    %119 = arith.divf %117, %118 : vector<4x128xf32>
    %120 = vector.extract_strided_slice %119 {offsets = [0, 0], sizes = [2, 128], strides = [1, 1]} : vector<4x128xf32> to vector<2x128xf32>
    %121 = vector.extract_strided_slice %119 {offsets = [2, 0], sizes = [2, 128], strides = [1, 1]} : vector<4x128xf32> to vector<2x128xf32>
    %122 = vector.extract_strided_slice %107 {offsets = [0, 256], sizes = [2, 128], strides = [1, 1]} : vector<2x384xf32> to vector<2x128xf32>
    %123 = vector.extract_strided_slice %105 {offsets = [0, 256], sizes = [2, 128], strides = [1, 1]} : vector<2x384xf32> to vector<2x128xf32>
    %124 = arith.mulf %120, %123 : vector<2x128xf32>
    %125 = arith.addf %122, %124 : vector<2x128xf32>
    %126 = math.tanh %125 : vector<2x128xf32>
    %cst_39 = arith.constant 1.000000e+00 : f32
    %127 = vector.broadcast %cst_39 : f32 to vector<2x128xf32>
    %128 = arith.subf %127, %121 : vector<2x128xf32>
    %129 = arith.mulf %128, %126 : vector<2x128xf32>
    %130 = arith.mulf %121, %102 : vector<2x128xf32>
    %131 = arith.addf %129, %130 : vector<2x128xf32>
    %cst_40 = arith.constant dense<0.000000e+00> : vector<2x128xf32>
    %132 = tpu.matmul %131, %13, %cst_40 {dimension_numbers = #tpu.dot_dimension_numbers<[1], [0], [0], [1], [0, 0, 1, 1], [], []>} : vector<2x128xf32>, vector<128x128xf32>, vector<2x128xf32> -> vector<2x128xf32>
    %133 = vector.broadcast %14 : vector<1x128xf32> to vector<2x128xf32>
    %134 = arith.addf %132, %133 : vector<2x128xf32>
    %135 = math.tanh %134 : vector<2x128xf32>
    %c2 = arith.constant 2 : index
    %c0_41 = arith.constant 0 : index
    %c0_42 = arith.constant 0 : index
    %136 = vector.load %arg11[%c2, %c0_41, %c0_42] : memref<4x2x128xf32, #tpu.memory_space<vmem>>, vector<1x2x128xf32>
    %137 = vector.shape_cast %136 : vector<1x2x128xf32> to vector<2x128xf32>
    %138 = vector.shape_cast %135 : vector<2x128xf32> to vector<1x2x128xf32>
    tpu.vector_store %arg11[%c2, %c0_41, %c0_42], %138 {strides = array<i32>} : memref<4x2x128xf32, #tpu.memory_space<vmem>>, vector<1x2x128xf32>,
    %cst_43 = arith.constant dense<0.000000e+00> : vector<2x128xf32>
    %139 = tpu.matmul %135, %7, %cst_43 {dimension_numbers = #tpu.dot_dimension_numbers<[1], [0], [0], [1], [0, 0, 1, 1], [], []>} : vector<2x128xf32>, vector<128x128xf32>, vector<2x128xf32> -> vector<2x128xf32>
    %140 = vector.broadcast %8 : vector<1x128xf32> to vector<2x128xf32>
    %141 = arith.addf %139, %140 : vector<2x128xf32>
    %cst_44 = arith.constant dense<0.000000e+00> : vector<2x384xf32>
    %142 = tpu.matmul %135, %10, %cst_44 {dimension_numbers = #tpu.dot_dimension_numbers<[1], [0], [0], [1], [0, 0, 1, 1], [], []>} : vector<2x128xf32>, vector<128x384xf32>, vector<2x384xf32> -> vector<2x384xf32>
    %143 = vector.broadcast %11 : vector<1x384xf32> to vector<2x384xf32>
    %144 = arith.addf %142, %143 : vector<2x384xf32>
    %145 = vector.extract_strided_slice %20 {offsets = [3, 0, 0], sizes = [1, 2, 384], strides = [1, 1, 1]} : vector<4x2x384xf32> to vector<1x2x384xf32>
    %146 = vector.shape_cast %145 : vector<1x2x384xf32> to vector<2x384xf32>
    %147 = vector.extract_strided_slice %146 {offsets = [0, 0], sizes = [2, 128], strides = [1, 1]} : vector<2x384xf32> to vector<2x128xf32>
    %148 = vector.extract_strided_slice %144 {offsets = [0, 0], sizes = [2, 128], strides = [1, 1]} : vector<2x384xf32> to vector<2x128xf32>
    %149 = arith.addf %147, %148 : vector<2x128xf32>
    %150 = vector.extract_strided_slice %146 {offsets = [0, 128], sizes = [2, 128], strides = [1, 1]} : vector<2x384xf32> to vector<2x128xf32>
    %151 = vector.extract_strided_slice %144 {offsets = [0, 128], sizes = [2, 128], strides = [1, 1]} : vector<2x384xf32> to vector<2x128xf32>
    %152 = arith.addf %150, %151 : vector<2x128xf32>
    %153 = tpu.concatenate %149, %152 in 0 : vector<2x128xf32>, vector<2x128xf32> -> vector<4x128xf32>
    %154 = arith.negf %153 : vector<4x128xf32>
    %155 = math.exp %154 : vector<4x128xf32>
    %cst_45 = arith.constant 1.000000e+00 : f32
    %156 = vector.broadcast %cst_45 : f32 to vector<4x128xf32>
    %157 = arith.addf %156, %155 : vector<4x128xf32>
    %158 = arith.divf %156, %157 : vector<4x128xf32>
    %159 = vector.extract_strided_slice %158 {offsets = [0, 0], sizes = [2, 128], strides = [1, 1]} : vector<4x128xf32> to vector<2x128xf32>
    %160 = vector.extract_strided_slice %158 {offsets = [2, 0], sizes = [2, 128], strides = [1, 1]} : vector<4x128xf32> to vector<2x128xf32>
    %161 = vector.extract_strided_slice %146 {offsets = [0, 256], sizes = [2, 128], strides = [1, 1]} : vector<2x384xf32> to vector<2x128xf32>
    %162 = vector.extract_strided_slice %144 {offsets = [0, 256], sizes = [2, 128], strides = [1, 1]} : vector<2x384xf32> to vector<2x128xf32>
    %163 = arith.mulf %159, %162 : vector<2x128xf32>
    %164 = arith.addf %161, %163 : vector<2x128xf32>
    %165 = math.tanh %164 : vector<2x128xf32>
    %cst_46 = arith.constant 1.000000e+00 : f32
    %166 = vector.broadcast %cst_46 : f32 to vector<2x128xf32>
    %167 = arith.subf %166, %160 : vector<2x128xf32>
    %168 = arith.mulf %167, %165 : vector<2x128xf32>
    %169 = arith.mulf %160, %141 : vector<2x128xf32>
    %170 = arith.addf %168, %169 : vector<2x128xf32>
    %cst_47 = arith.constant dense<0.000000e+00> : vector<2x128xf32>
    %171 = tpu.matmul %170, %13, %cst_47 {dimension_numbers = #tpu.dot_dimension_numbers<[1], [0], [0], [1], [0, 0, 1, 1], [], []>} : vector<2x128xf32>, vector<128x128xf32>, vector<2x128xf32> -> vector<2x128xf32>
    %172 = vector.broadcast %14 : vector<1x128xf32> to vector<2x128xf32>
    %173 = arith.addf %171, %172 : vector<2x128xf32>
    %174 = math.tanh %173 : vector<2x128xf32>
    %c3 = arith.constant 3 : index
    %c0_48 = arith.constant 0 : index
    %c0_49 = arith.constant 0 : index
    %175 = vector.load %arg11[%c3, %c0_48, %c0_49] : memref<4x2x128xf32, #tpu.memory_space<vmem>>, vector<1x2x128xf32>
    %176 = vector.shape_cast %175 : vector<1x2x128xf32> to vector<2x128xf32>
    %177 = vector.shape_cast %174 : vector<2x128xf32> to vector<1x2x128xf32>
    tpu.vector_store %arg11[%c3, %c0_48, %c0_49], %177 {strides = array<i32>} : memref<4x2x128xf32, #tpu.memory_space<vmem>>, vector<1x2x128xf32>,
    %c0_50 = arith.constant 0 : index
    %c0_51 = arith.constant 0 : index
    %178 = vector.load %arg12[%c0_50, %c0_51] : memref<2x128xf32, #tpu.memory_space<vmem>>, vector<2x128xf32>
    tpu.vector_store %arg12[%c0_50, %c0_51], %174 {strides = array<i32>} : memref<2x128xf32, #tpu.memory_space<vmem>>, vector<2x128xf32>,
    return
  }
  func.func @transform_0(%arg0: i32) -> (i32, i32, i32) {
    %c0_i32 = arith.constant 0 : i32
    %c0_i32_0 = arith.constant 0 : i32
    %c0_i32_1 = arith.constant 0 : i32
    return %arg0, %c0_i32, %c0_i32_0 : i32, i32, i32
  }
  func.func @transform_1(%arg0: i32) -> (i32, i32) {
    %c0_i32 = arith.constant 0 : i32
    %c0_i32_0 = arith.constant 0 : i32
    %c0_i32_1 = arith.constant 0 : i32
    return %c0_i32, %c0_i32_0 : i32, i32
  }
  func.func @transform_2(%arg0: i32) -> (i32, i32) {
    %c0_i32 = arith.constant 0 : i32
    %c0_i32_0 = arith.constant 0 : i32
    %c0_i32_1 = arith.constant 0 : i32
    return %c0_i32, %c0_i32_0 : i32, i32
  }
  func.func @transform_3(%arg0: i32) -> (i32, i32) {
    %c0_i32 = arith.constant 0 : i32
    %c0_i32_0 = arith.constant 0 : i32
    %c0_i32_1 = arith.constant 0 : i32
    return %c0_i32, %c0_i32_0 : i32, i32
  }
  func.func @transform_4(%arg0: i32) -> (i32, i32) {
    %c0_i32 = arith.constant 0 : i32
    %c0_i32_0 = arith.constant 0 : i32
    %c0_i32_1 = arith.constant 0 : i32
    return %c0_i32, %c0_i32_0 : i32, i32
  }
  func.func @transform_5(%arg0: i32) -> (i32, i32) {
    %c0_i32 = arith.constant 0 : i32
    %c0_i32_0 = arith.constant 0 : i32
    %c0_i32_1 = arith.constant 0 : i32
    return %c0_i32, %c0_i32_0 : i32, i32
  }
  func.func @transform_6(%arg0: i32) -> (i32, i32) {
    %c0_i32 = arith.constant 0 : i32
    %c0_i32_0 = arith.constant 0 : i32
    %c0_i32_1 = arith.constant 0 : i32
    return %c0_i32, %c0_i32_0 : i32, i32
  }
  func.func @transform_7(%arg0: i32) -> (i32, i32) {
    %c0_i32 = arith.constant 0 : i32
    %c0_i32_0 = arith.constant 0 : i32
    %c0_i32_1 = arith.constant 0 : i32
    return %c0_i32, %c0_i32_0 : i32, i32
  }
  func.func @transform_8(%arg0: i32) -> (i32, i32) {
    %c0_i32 = arith.constant 0 : i32
    %c0_i32_0 = arith.constant 0 : i32
    %c0_i32_1 = arith.constant 0 : i32
    return %c0_i32, %c0_i32_0 : i32, i32
  }
  func.func @transform_9(%arg0: i32) -> (i32, i32) {
    %c0_i32 = arith.constant 0 : i32
    %c0_i32_0 = arith.constant 0 : i32
    %c0_i32_1 = arith.constant 0 : i32
    return %c0_i32, %c0_i32_0 : i32, i32
  }
  func.func @transform_10(%arg0: i32) -> (i32, i32, i32) {
    %c0_i32 = arith.constant 0 : i32
    %c0_i32_0 = arith.constant 0 : i32
    %c0_i32_1 = arith.constant 0 : i32
    return %arg0, %c0_i32, %c0_i32_0 : i32, i32, i32
  }
}

</mosaic_0001>

<bundles_post_ra>
// kernel: _lambda_.1
= control target key start
LH: loop header
LB: loop body
LE: loop exit
PB: predicated region body
PF: predicated region fallthrough
CT: control target
= control target key end

     0   :  { %s3594_s13 = smov 0   ;;  %s4210_s0 = inlined_call_operand.vmem [shape: f32[8,2,32], index: 0, kind: input, shape index: {}]   ;;  %s4211_s1 = inlined_call_operand.vmem [shape: f32[2,128], index: 1, kind: input, shape index: {}]   ;;  %s4212_s2 = inlined_call_operand.vmem [shape: bf16[32,384], index: 2, kind: input, shape index: {}]   ;;  %s4213_s3 = inlined_call_operand.vmem [shape: f32[1,384], index: 3, kind: input, shape index: {}]   ;;  %s4214_s4 = inlined_call_operand.vmem [shape: bf16[128,128], index: 4, kind: input, shape index: {}]   ;;  %s4215_s5 = inlined_call_operand.vmem [shape: f32[1,128], index: 5, kind: input, shape index: {}]   ;;  %s4216_s6 = inlined_call_operand.vmem [shape: bf16[128,384], index: 6, kind: input, shape index: {}]   ;;  %s4217_s7 = inlined_call_operand.vmem [shape: f32[1,384], index: 7, kind: input, shape index: {}]   ;;  %s4218_s8 = inlined_call_operand.vmem [shape: bf16[128,128], index: 8, kind: input, shape index: {}]   ;;  %s4219_s9 = inlined_call_operand.vmem [shape: f32[1,128], index: 9, kind: input, shape index: {}]   ;;  %s4220_s10 = inlined_call_operand.vmem [shape: f32[8,2,128], index: 10, kind: output, shape index: {}]  }
   0x1 LB: > { %s2170_s14 = sadd.s32 4294967295, %s3533_s13   ;;  %p2174_p0 = scmp.ge.s32.totalorder %s3533_s13, 1  ;;  %s3533_s13 = sphi %s3594_s13, %s20_s13  }
   0x2   : > { %p313_p1 = scmp.lt.s32.totalorder %s3533_s13, 3 }
   0x4   : > { %p314_p2 = pnand %p2174_p0, %p313_p1 }
   0x6   : > { %317 = sbr.rel (%p314_p2) target bundleno = 2062 (0x80e), region = 60 }
   0xd   : > { %s2175_s15 = sshll.u32 %s2170_s14, 2  ;;  %p2179_p4 = scmp.ne.s32.totalorder %s2170_s14, 0 }
   0xe   : > { %p352_p3 = scmp.lt.s32.totalorder %s2175_s15, 7  ;;  %v367_v0 = vld [vmem:[%s4211_s1] sm:$0x3] (!%p2179_p4) }
   0xf   : > { %366 = sbr.rel (%p2179_p4) target bundleno = 22 (0x16), region = 64  ;;  %368 = vst [vmem:[#allocation2] sm:$0x3] (!%p2179_p4), %v367_v0 }
  0x10   : > { %s4248_s15 = smov (!%p352_p3, %s2175_s15), 7 }
  0x11   : > { %s2176_s16 = sshll.u32 %s4248_s15, 1 }
  0x12   : > { %s355_s19 = scalar_lea.vmem %s4210_s0, %s2176_s16  ;;  %s3608_s22 = scalar_lea.vmem %s4220_s10, %s2176_s16 }
  0x16 PF: > { %v3455_v1 = vld [vmem:[%s4212_s2 + $0x4] ss:$12 sps:$4 sm:$0xff]   ;;  %v4221_v2 = vmov 0.0|0.0   ;;  %v3457_v3 = vld [vmem:[%s4212_s2 + $0x8] ss:$12 sps:$4 sm:$0xff]   ;;  %v4223_v4 = vmov 0.0   ;;  %v542_v9 = vlaneseq }
  0x17   : > { %2919 = vmatprep.subr.bf16.mxu1 %v4221_v2  ;;  %645 = vmatprep.mubr.f32.mxu0 %v4223_v4  ;;  %v3458_v5 = vld [vmem:[%s4212_s2] ss:$12 sps:$4 sm:$0xff]   ;;  %v3459_v6 = vld [vmem:[%s4212_s2 + $0x1c] ss:$12 sps:$4 sm:$0xff]   ;;  %vm3537_vm0 = vmmov 0   ;;  %vm578_vm1 = vcmask 261120  }
  0x18   : > { %2912 = vmatprep.subr.bf16.mxu0 %v3455_v1  ;;  %2921 = vmatpush3.bf16.msra.mxu1 %v3457_v3  ;;  %v3461_v7 = vld [vmem:[%s4212_s2 + $0x20] ss:$12 sps:$4 sm:$0xff]   ;;  %v3462_v8 = vld [vmem:[%s4212_s2 + $0x18] ss:$12 sps:$4 sm:$0xff]   ;;  %v3642_v15 = vshrl.u32 %v542_v9, 7  ;;  %v3697_v32 = vld [vmem:[%s4214_s4 + $0x10] sm:$0xff]  }
  0x19   : > { %2488 = vmatprep.mubr.msk.f32.mxu1 %vm3537_vm0, %v4223_v4  ;;  %2914 = vmatpush1.bf16.msra.mxu0 %v3458_v5  ;;  %v3639_v10 = vld [vmem:[%s4216_s6 + $0x4] ss:$12 sps:$4 sm:$0xff]   ;;  %v537_v11 = vld [vmem:[%s355_s19] sm:$0x3]  ;;  %v538_v12 = vld [vmem:[%s355_s19 + $0x2] sm:$0x3] }
  0x1a   : > { %2922 = vmatprep.subr.bf16.mxu1 %v4221_v2  ;;  %2916 = vmatprep.subr.bf16.mxu0 %v3459_v6  ;;  %v539_v13 = vld [vmem:[%s355_s19 + $0x4] sm:$0x3]  ;;  %v540_v14 = vld [vmem:[%s355_s19 + $0x6] sm:$0x3]  ;;  %v3538_v16 = vmov 1983009808   ;;  %v561_v18 = vcombine.low %v537_v11, %v538_v12 }
  0x1b   : > { %v564_v17 = vunpack.c.l.s4 %v3538_v16  ;;  %v562_v19 = vcombine.low %v539_v13, %v540_v14  ;;  %v3653_v24 = vld [vmem:[%s4216_s6] ss:$12 sps:$4 sm:$0xff]   ;;  %v3663_v27 = vld [vmem:[%s4216_s6 + $0x1c] ss:$12 sps:$4 sm:$0xff]   ;;  %v3670_v28 = vld [vmem:[%s4216_s6 + $0x18] ss:$12 sps:$4 sm:$0xff]  }
  0x1c   : > { %2924 = vmatpush3.bf16.msra.mxu1 %v3461_v7  ;;  %v3658_v25 = vld [vmem:[%s4214_s4] sm:$0xff]   ;;  %v3675_v29 = vld [vmem:[%s4214_s4 + $0x8] sm:$0xff]   ;;  %v3690_v31 = vld [vmem:[%s4216_s6 + $0x30] ss:$12 sps:$4 sm:$0xff]   ;;  %v544_v1 = vsub.s32 0, %v3642_v15  ;;  %v552_v3 = vsub.s32 2, %v3642_v15 }
  0x1d   : > { %2918 = vmatpush1.bf16.msra.mxu0 %v3462_v8  ;;  %2950 = vmatprep.subr.bf16.mxu1 %v3639_v10  ;;  %v565_v20 = vunpack.c.0.s8 %v564_v17  ;;  %v3682_v30 = vld [vmem:[%s4216_s6 + $0x34] ss:$12 sps:$4 sm:$0xff]   ;;  %v3704_v33 = vld [vmem:[%s4216_s6 + $0x4c] ss:$12 sps:$4 sm:$0xff]   ;;  %v3723_v36 = vld [vmem:[%s4216_s6 + $0x64] ss:$12 sps:$4 sm:$0xff]  }
  0x1e   : > { %2925 = vmatprep.subr.bf16.mxu0 %v4221_v2  ;;  %v3711_v34 = vld [vmem:[%s4216_s6 + $0x48] ss:$12 sps:$4 sm:$0xff]   ;;  %v3718_v35 = vld [vmem:[%s4214_s4 + $0x18] sm:$0xff]   ;;  %v3730_v37 = vld [vmem:[%s4216_s6 + $0x60] ss:$12 sps:$4 sm:$0xff]   ;;  %v548_v6 = vsub.s32 1, %v3642_v15 }
  0x1f   : > { %v3646_v21 = vsub.s32 %v565_v20, %v3642_v15  ;;  %v3737_v38 = vld [vmem:[%s4214_s4 + $0x20] sm:$0xff]   ;;  %v3742_v39 = vld [vmem:[%s4216_s6 + $0x7c] ss:$12 sps:$4 sm:$0xff]   ;;  %v3775_v44 = vld [vmem:[%s4214_s4 + $0x30] sm:$0xff]   ;;  %vm1012_vm2 = vcmask 1041408  }
  0x20   : > { %v3749_v40 = vld [vmem:[%s4216_s6 + $0x78] ss:$12 sps:$4 sm:$0xff]   ;;  %v3756_v41 = vld [vmem:[%s4214_s4 + $0x28] sm:$0xff]   ;;  %v3761_v42 = vld [vmem:[%s4216_s6 + $0x94] ss:$12 sps:$4 sm:$0xff]  }
  0x21   : > { %v569_v22 = vrot.slane %v561_v18, %v3646_v21  ;;  %v576_v23 = vrot.slane %v562_v19, %v3646_v21  ;;  %v3768_v43 = vld [vmem:[%s4216_s6 + $0x90] ss:$12 sps:$4 sm:$0xff]   ;;  %v3780_v45 = vld [vmem:[%s4216_s6 + $0xac] ss:$12 sps:$4 sm:$0xff]   ;;  %v3787_v46 = vld [vmem:[%s4216_s6 + $0xa8] ss:$12 sps:$4 sm:$0xff]  }
  0x22   : > { %v3794_v47 = vld [vmem:[%s4214_s4 + $0x38] sm:$0xff]   ;;  %v764_v48 = vld [vmem:[#allocation2] sm:$0x3]  ;;  %v3801_v49 = vld [vmem:[%s4216_s6 + $0x8] ss:$12 sps:$4 sm:$0xff]  }
  0x23   : > { %v577_v26 = vcombine.low %v569_v22, %v576_v23  ;;  %4233 = vst [vmem:[#allocation3_spill] sm:$0xff] %v3794_v47  ;;  %v3809_v50 = vld [vmem:[%s4216_s6 + $0x20] ss:$12 sps:$4 sm:$0xff]   ;;  %v3820_v51 = vld [vmem:[%s4216_s6 + $0x38] ss:$12 sps:$4 sm:$0xff]   ;;  %v3895_v59 = vld [vmem:[%s4218_s8 + $0x10] sm:$0xff]  }
  0x24   : > { %v3827_v52 = vld [vmem:[%s4216_s6 + $0x50] ss:$12 sps:$4 sm:$0xff]   ;;  %v3834_v53 = vld [vmem:[%s4216_s6 + $0x68] ss:$12 sps:$4 sm:$0xff]   ;;  %v3841_v54 = vld [vmem:[%s4216_s6 + $0x80] ss:$12 sps:$4 sm:$0xff]  }
  0x25   : > { %2180 = vmatmul.mubr.msk.f32.vlgmr.msra.gmra.mrb[0].mxu0 %vm578_vm1, %v577_v26  ;;  %2489 = vmatmul.mubr.msk.f32.vlgmr.msra.gmra.mrb[0].mxu1 %vm578_vm1, %v577_v26  ;;  %v3848_v55 = vld [vmem:[%s4216_s6 + $0x98] ss:$12 sps:$4 sm:$0xff]   ;;  %v3855_v56 = vld [vmem:[%s4216_s6 + $0xb0] ss:$12 sps:$4 sm:$0xff]   ;;  %v3888_v58 = vld [vmem:[%s4218_s8 + $0x8] sm:$0xff]  }
  0x26   : > { %2952 = vmatpush1.bf16.msra.mxu1 %v3653_v24  ;;  %2927 = vmatpush3.bf16.msra.mxu0 %v3658_v25  ;;  %v3881_v57 = vld [vmem:[%s4218_s8] sm:$0xff]   ;;  %v3902_v60 = vld [vmem:[%s4218_s8 + $0x18] sm:$0xff]   ;;  %v3916_v62 = vld [vmem:[%s4218_s8 + $0x28] sm:$0xff]  }
  0x27   : > { %2954 = vmatprep.subr.bf16.mxu1 %v3663_v27  ;;  %2928 = vmatprep.subr.bf16.mxu0 %v4221_v2  ;;  %v3909_v61 = vld [vmem:[%s4218_s8 + $0x20] sm:$0xff]   ;;  %v3923_v63 = vld [vmem:[%s4218_s8 + $0x30] sm:$0xff]   ;;  %v3930_v0 = vld [vmem:[%s4218_s8 + $0x38] sm:$0xff]  }
  0x28   : > { %921 = vmatprep.mubr.f32.mxu1 %v4223_v4  ;;  %2523 = vmatprep.mubr.msk.f32.mxu0 %vm3537_vm0, %v4223_v4  ;;  %v389_v5 = vld [vmem:[%s4213_s3] sm:$0x7] }
  0x29   : > { %v545_v7 = vrot.slane %v389_v5, %v544_v1  ;;  %v553_v8 = vrot.slane %v389_v5, %v552_v3  ;;  %v549_v9 = vrot.slane %v389_v5, %v548_v6 }
  0x2a   : > { %2956 = vmatpush1.bf16.msra.mxu1 %v3670_v28  ;;  %2930 = vmatpush3.bf16.msra.mxu0 %v3675_v29 }
  0x2b   : > { %2958 = vmatprep.subr.bf16.mxu1 %v3682_v30  ;;  %2931 = vmatprep.subr.bf16.mxu0 %v4221_v2 }
  0x2e   : > { %2960 = vmatpush1.bf16.msra.mxu1 %v3690_v31  ;;  %2933 = vmatpush3.bf16.msra.mxu0 %v3697_v32 }
  0x2f   : > { %2962 = vmatprep.subr.bf16.mxu1 %v3704_v33  ;;  %2934 = vmatprep.subr.bf16.mxu0 %v4221_v2 }
  0x32   : > { %2964 = vmatpush1.bf16.msra.mxu1 %v3711_v34  ;;  %2936 = vmatpush3.bf16.msra.mxu0 %v3718_v35 }
  0x33   : > { %2966 = vmatprep.subr.bf16.mxu1 %v3723_v36  ;;  %2937 = vmatprep.subr.bf16.mxu0 %v4221_v2 }
  0x36   : > { %2968 = vmatpush1.bf16.msra.mxu1 %v3730_v37  ;;  %2939 = vmatpush3.bf16.msra.mxu0 %v3737_v38 }
  0x37   : > { %2970 = vmatprep.subr.bf16.mxu1 %v3742_v39  ;;  %2940 = vmatprep.subr.bf16.mxu0 %v4221_v2 }
  0x3a   : > { %2972 = vmatpush1.bf16.msra.mxu1 %v3749_v40  ;;  %2942 = vmatpush3.bf16.msra.mxu0 %v3756_v41 }
  0x3b   : > { %2974 = vmatprep.subr.bf16.mxu1 %v3761_v42  ;;  %2943 = vmatprep.subr.bf16.mxu0 %v4221_v2 }
  0x3e   : > { %2976 = vmatpush1.bf16.msra.mxu1 %v3768_v43  ;;  %2945 = vmatpush3.bf16.msra.mxu0 %v3775_v44 }
  0x3f   : > { %2978 = vmatprep.subr.bf16.mxu1 %v3780_v45  ;;  %2946 = vmatprep.subr.bf16.mxu0 %v4221_v2 }
  0x42   : > { %2980 = vmatpush1.bf16.msra.mxu1 %v3787_v46  ;;  %2948 = vmatpush3.bf16.msra.mxu0 %v3794_v47 }
  0x43   : > { %2981 = vmatprep.subr.bf16.mxu0 %v4221_v2  ;;  %3005 = vmatprep.subr.bf16.mxu1 %v4221_v2 }
  0x45   : > { %922 = vmatmul.mubr.f32.vlgmr.msra.gmra.mrb[2].mxu1 %v764_v48  ;;  %2524 = vmatmul.mubr.f32.vlgmr.msra.gmra.mrb[2].mxu0 %v764_v48 }
  0x46   : > { %2983 = vmatpush3.bf16.msra.mxu0 %v3801_v49  ;;  %2558 = vmatprep.mubr.msk.f32.mxu0 %vm3537_vm0, %v4223_v4 }
  0x47   : > { %2984 = vmatprep.subr.bf16.mxu0 %v4221_v2  ;;  %2593 = vmatprep.mubr.msk.f32.mxu1 %vm3537_vm0, %v4223_v4 }
  0x48   : > { %3007 = vmatpush3.bf16.msra.mxu1 %v3881_v57 }
  0x49   : > { %3008 = vmatprep.subr.bf16.mxu1 %v4221_v2 }
  0x4a   : > { %2986 = vmatpush3.bf16.msra.mxu0 %v3809_v50 }
  0x4b   : > { %2987 = vmatprep.subr.bf16.mxu0 %v4221_v2 }
  0x4c   : > { %3010 = vmatpush3.bf16.msra.mxu1 %v3888_v58 }
  0x4d   : > { %3011 = vmatprep.subr.bf16.mxu1 %v4221_v2 }
  0x4e   : > { %2989 = vmatpush3.bf16.msra.mxu0 %v3820_v51 }
  0x4f   : > { %2990 = vmatprep.subr.bf16.mxu0 %v4221_v2 }
  0x50   : > { %3013 = vmatpush3.bf16.msra.mxu1 %v3895_v59 }
  0x51   : > { %3014 = vmatprep.subr.bf16.mxu1 %v4221_v2 }
  0x52   : > { %2992 = vmatpush3.bf16.msra.mxu0 %v3827_v52 }
  0x53   : > { %2993 = vmatprep.subr.bf16.mxu0 %v4221_v2 }
  0x54   : > { %3016 = vmatpush3.bf16.msra.mxu1 %v3902_v60 }
  0x55   : > { %3017 = vmatprep.subr.bf16.mxu1 %v4221_v2 }
  0x56   : > { %2995 = vmatpush3.bf16.msra.mxu0 %v3834_v53 }
  0x57   : > { %2996 = vmatprep.subr.bf16.mxu0 %v4221_v2 }
  0x58   : > { %3019 = vmatpush3.bf16.msra.mxu1 %v3909_v61 }
  0x59   : > { %3020 = vmatprep.subr.bf16.mxu1 %v4221_v2 }
  0x5a   : > { %2998 = vmatpush3.bf16.msra.mxu0 %v3841_v54 }
  0x5b   : > { %2999 = vmatprep.subr.bf16.mxu0 %v4221_v2 }
  0x5c   : > { %3022 = vmatpush3.bf16.msra.mxu1 %v3916_v62 }
  0x5d   : > { %3023 = vmatprep.subr.bf16.mxu1 %v4221_v2 }
  0x5e   : > { %3001 = vmatpush3.bf16.msra.mxu0 %v3848_v55 }
  0x5f   : > { %3002 = vmatprep.subr.bf16.mxu0 %v4221_v2 }
  0x60   : > { %3025 = vmatpush3.bf16.msra.mxu1 %v3923_v63 }
  0x61   : > { %3026 = vmatprep.subr.bf16.mxu1 %v4221_v2 }
  0x62   : > { %3004 = vmatpush3.bf16.msra.mxu0 %v3855_v56 }
  0x63   : > { %3029 = vmatprep.subr.bf16.mxu0 %v4221_v2 }
  0x64   : > { %3028 = vmatpush3.bf16.msra.mxu1 %v3930_v0 }
  0x65   : > { %2559 = vmatmul.mubr.f32.vlgmr.msra.gmra.mrb[4].mxu0 %v764_v48  ;;  %3054 = vmatprep.subr.bf16.mxu1 %v3639_v10 }
  0x66   : > { %3031 = vmatpush3.bf16.msra.mxu0 %v3658_v25  ;;  %2628 = vmatprep.mubr.msk.f32.mxu0 %vm3537_vm0, %v4223_v4 }
  0x67   : > { %3032 = vmatprep.subr.bf16.mxu0 %v4221_v2 }
  0x6a   : > { %3034 = vmatpush3.bf16.msra.mxu0 %v3675_v29 }
  0x6b   : > { %3035 = vmatprep.subr.bf16.mxu0 %v4221_v2 }
  0x6e   : > { %3037 = vmatpush3.bf16.msra.mxu0 %v3697_v32 }
  0x6f   : > { %3038 = vmatprep.subr.bf16.mxu0 %v4221_v2 }
  0x72   : > { %3040 = vmatpush3.bf16.msra.mxu0 %v3718_v35 }
  0x73   : > { %3041 = vmatprep.subr.bf16.mxu0 %v4221_v2 }
  0x76   : > { %3043 = vmatpush3.bf16.msra.mxu0 %v3737_v38 }
  0x77   : > { %3044 = vmatprep.subr.bf16.mxu0 %v4221_v2 }
  0x7a   : > { %3046 = vmatpush3.bf16.msra.mxu0 %v3756_v41 }
  0x7b   : > { %3047 = vmatprep.subr.bf16.mxu0 %v4221_v2 }
  0x7e   : > { %3049 = vmatpush3.bf16.msra.mxu0 %v3775_v44 }
  0x7f   : > { %3050 = vmatprep.subr.bf16.mxu0 %v4221_v2 }
  0x82   : > { %3052 = vmatpush3.bf16.msra.mxu0 %v3794_v47 }
  0x83   : > { %3085 = vmatprep.subr.bf16.mxu0 %v4221_v2 }
  0xf8   : > { %v647_v11 = vpop.f32.mrb[0].mxu0  ;;  %v718_v12 = vpop.f32.mrb[0].mxu1 }
  0xf9   : > { %v648_v13 = vadd.f32 %v647_v11, %v545_v7  ;;  %v719_v14 = vadd.f32 %v718_v12, %v553_v8  ;;  %v649_v16 = vpop.f32.mrb[1].mxu0  ;;  %v2490_v17 = vpop.f32.mrb[1].mxu1  ;;  %v503_v8 = vld [vmem:[%s4217_s7] sm:$0x7] }
  0xfa   : > { %v650_v18 = vadd.f32 %v649_v16, %v549_v9  ;;  %v3953_v9 = vrot.slane %v503_v8, %v544_v1  ;;  %v3955_v11 = vrot.slane %v503_v8, %v548_v6 }
  0xfb   : > { %v727_v19 = vcombine.high %v719_v14, %v719_v14  ;;  %v748_v26 = vrot.slane %v719_v14, %v3646_v21 }
  0xfc   : > { %v725_v20 = vcombine.low %v648_v13, %v650_v18  ;;  %v726_v22 = vcombine.high %v648_v13, %v650_v18  ;;  %4237 = vst [vmem:[#allocation7_spill] sm:$0xff] %v3953_v9  ;;  %4238 = vst [vmem:[#allocation8_spill] sm:$0xff] %v3955_v11 }
  0xfd   : > { %v755_v23 = vrot.slane %v727_v19, %v3646_v21 }
  0xfe   : > { %v734_v48 = vrot.slane %v725_v20, %v3646_v21  ;;  %v741_v15 = vrot.slane %v726_v22, %v3646_v21 }
 0x100   : > { %v756_v2 = vcombine.low %v734_v48, %v748_v26  ;;  %v3944_v5 = vcombine.high %v734_v48, %v748_v26  ;;  %v3946_v4 = vcombine.low %v741_v15, %v755_v23  ;;  %v3948_v7 = vcombine.high %v741_v15, %v755_v23 }
 0x102   : > { %4234 = vst [vmem:[#allocation4_spill] sm:$0xff] %v3944_v5  ;;  %4235 = vst [vmem:[#allocation5_spill] sm:$0xff] %v3946_v4  ;;  %v999_v19 = vrot.slane %v756_v2, 2 }
 0x103   : > { %4236 = vst [vmem:[#allocation6_spill] sm:$0xff] %v3948_v7 }
 0x118   : > { %v923_v12 = vpop.f32.mrb[2].mxu1  ;;  %v837_v13 = vpop.f32.mrb[2].mxu0 }
 0x119   : > { %v924_v14 = vadd.f32 %v923_v12, %v3953_v9  ;;  %v925_v16 = vpop.f32.mrb[3].mxu1  ;;  %v2525_v17 = vpop.f32.mrb[3].mxu0  ;;  %v3964_v12 = vld [vmem:[%s4215_s5] ss:$0 sm:$0xff] }
 0x11a   : > { %v926_v18 = vadd.f32 %v925_v16, %v3955_v11  ;;  %v3966_v16 = vrot.slane %v503_v8, %v552_v3 }
 0x11b   : > { %v998_v20 = vadd.f32 %v924_v14, %v756_v2  ;;  %v838_v14 = vadd.f32 %v3964_v12, %v837_v13  ;;  %v4239_v13 = vmov 0.0  }
 0x11c   : > { %v1001_v22 = vadd.f32 %v999_v19, %v926_v18 }
 0x11e   : > { %v1003_v23 = vcombine.low %v1001_v22, %v1001_v22  ;;  %v1038_v22 = vrot.slane %v838_v14, 6 }
 0x120   : > { %v1010_v26 = vrot.slane %v1003_v23, %v3646_v21 }
 0x122   : > { %v1013_v1 = vsel %vm1012_vm2, %v998_v20, %v1010_v26 }
 0x123   : > { %v2183_v48 = vmul.f32 -1.442695, %v1013_v1  ;;  %v1021_v1 = vrot.slane %v756_v2, 4  ;;  %v4240_v2 = vmov 0.0|0.0  }
 0x125   : > { %3495 = vpow2.f32 %v2183_v48 }
 0x12f   : > { %v3496_v6 = vpop.eup %3495 }
 0x130   : > { %v1017_v15 = vadd.f32 1.0, %v3496_v6 }
 0x132   : > { %3497 = vrcp.f32 %v1017_v15 }
 0x138   : > { %v994_v17 = vpop.f32.mrb[4].mxu0 }
 0x139   : > { %v995_v18 = vadd.f32 %v994_v17, %v3966_v16  ;;  %v2560_v19 = vpop.f32.mrb[5].mxu0 }
 0x13c   : > { %v3498_v20 = vpop.eup %3497 }
 0x13d   : > { %v1040_v23 = vmul.f32 %v3498_v20, %v1038_v22  ;;  %v1020_v26 = vmul.f32 %v3498_v20, %v995_v18  ;;  %v1025_v4 = vsub.f32 1.0, %v3498_v20 }
 0x13f   : > { %v1023_v48 = vadd.f32 %v1021_v1, %v1020_v26  ;;  %v4241_v1 = vld [vmem:[#allocation4_spill] sm:$0xff] }
 0x141   : > { %3499 = vtanh.f32 %v1023_v48  ;;  %v1335_v48 = vrot.slane %v4241_v1, 2 }
 0x14b   : > { %v3500_v6 = vpop.eup %3499 }
 0x14c   : > { %v1027_v15 = vcombine.low %v3500_v6, %v3500_v6 }
 0x14e   : > { %v1034_v7 = vrot.slane %v1027_v15, %v3646_v21 }
 0x150   : > { %v1036_v3 = vmul.f32 %v1034_v7, %v1025_v4  ;;  %v3991_v4 = vld [vmem:[%s4219_s9] ss:$0 sm:$0xff] }
 0x152   : > { %v1041_v8 = vadd.f32 %v1040_v23, %v1036_v3 }
 0x154   : > { %v1049_v5 = vrot.slane %v1041_v8, 2 }
 0x156   : > { %2594 = vmatmul.mubr.f32.vlgmr.msra.gmra.mrb[4].mxu1 %v1049_v5 }
 0x157   : > { %3056 = vmatpush1.bf16.msra.mxu1 %v3653_v24  ;;  %1257 = vmatprep.mubr.f32.mxu1 %v4239_v13 }
 0x158   : > { %3058 = vmatprep.subr.bf16.mxu1 %v3663_v27 }
 0x15b   : > { %3060 = vmatpush1.bf16.msra.mxu1 %v3670_v28 }
 0x15c   : > { %3062 = vmatprep.subr.bf16.mxu1 %v3682_v30 }
 0x15f   : > { %3064 = vmatpush1.bf16.msra.mxu1 %v3690_v31 }
 0x160   : > { %3066 = vmatprep.subr.bf16.mxu1 %v3704_v33 }
 0x163   : > { %3068 = vmatpush1.bf16.msra.mxu1 %v3711_v34 }
 0x164   : > { %3070 = vmatprep.subr.bf16.mxu1 %v3723_v36 }
 0x167   : > { %3072 = vmatpush1.bf16.msra.mxu1 %v3730_v37 }
 0x168   : > { %3074 = vmatprep.subr.bf16.mxu1 %v3742_v39 }
 0x16b   : > { %3076 = vmatpush1.bf16.msra.mxu1 %v3749_v40 }
 0x16c   : > { %3078 = vmatprep.subr.bf16.mxu1 %v3761_v42 }
 0x16f   : > { %3080 = vmatpush1.bf16.msra.mxu1 %v3768_v43 }
 0x170   : > { %3082 = vmatprep.subr.bf16.mxu1 %v3780_v45 }
 0x173   : > { %3084 = vmatpush1.bf16.msra.mxu1 %v3787_v46 }
 0x174   : > { %3109 = vmatprep.subr.bf16.mxu1 %v4240_v2 }
 0x229   : > { %v1117_v5 = vpop.f32.mrb[4].mxu1 }
 0x22a   : > { %v1118_v7 = vadd.f32 %v3991_v4, %v1117_v5  ;;  %v2595_v14 = vpop.f32.mrb[5].mxu1 }
 0x22c   : > { %3501 = vtanh.f32 %v1118_v7 }
 0x236   : > { %v3502_v17 = vpop.eup %3501 }
 0x237   : > { %1122 = vst [vmem:[%s3608_s22] sm:$0x3] %v3502_v17  ;;  %2629 = vmatmul.mubr.f32.vlgmr.msra.gmra.mrb[6].mxu0 %v3502_v17  ;;  %1258 = vmatmul.mubr.f32.vlgmr.msra.gmra.mrb[6].mxu1 %v3502_v17 }
 0x238   : > { %3087 = vmatpush3.bf16.msra.mxu0 %v3801_v49  ;;  %2663 = vmatprep.mubr.msk.f32.mxu0 %vm3537_vm0, %v4239_v13 }
 0x239   : > { %3088 = vmatprep.subr.bf16.mxu0 %v4240_v2  ;;  %3111 = vmatpush3.bf16.msra.mxu1 %v3881_v57 }
 0x23a   : > { %3112 = vmatprep.subr.bf16.mxu1 %v4240_v2  ;;  %2698 = vmatprep.mubr.msk.f32.mxu1 %vm3537_vm0, %v4239_v13 }
 0x23c   : > { %3090 = vmatpush3.bf16.msra.mxu0 %v3809_v50 }
 0x23d   : > { %3091 = vmatprep.subr.bf16.mxu0 %v4240_v2  ;;  %3114 = vmatpush3.bf16.msra.mxu1 %v3888_v58 }
 0x23e   : > { %3115 = vmatprep.subr.bf16.mxu1 %v4240_v2 }
 0x240   : > { %3093 = vmatpush3.bf16.msra.mxu0 %v3820_v51 }
 0x241   : > { %3094 = vmatprep.subr.bf16.mxu0 %v4240_v2  ;;  %3117 = vmatpush3.bf16.msra.mxu1 %v3895_v59 }
 0x242   : > { %3118 = vmatprep.subr.bf16.mxu1 %v4240_v2 }
 0x244   : > { %3096 = vmatpush3.bf16.msra.mxu0 %v3827_v52 }
 0x245   : > { %3097 = vmatprep.subr.bf16.mxu0 %v4240_v2  ;;  %3120 = vmatpush3.bf16.msra.mxu1 %v3902_v60 }
 0x246   : > { %3121 = vmatprep.subr.bf16.mxu1 %v4240_v2 }
 0x248   : > { %3099 = vmatpush3.bf16.msra.mxu0 %v3834_v53 }
 0x249   : > { %3100 = vmatprep.subr.bf16.mxu0 %v4240_v2  ;;  %3123 = vmatpush3.bf16.msra.mxu1 %v3909_v61 }
 0x24a   : > { %3124 = vmatprep.subr.bf16.mxu1 %v4240_v2 }
 0x24c   : > { %3102 = vmatpush3.bf16.msra.mxu0 %v3841_v54 }
 0x24d   : > { %3103 = vmatprep.subr.bf16.mxu0 %v4240_v2  ;;  %3126 = vmatpush3.bf16.msra.mxu1 %v3916_v62 }
 0x24e   : > { %3127 = vmatprep.subr.bf16.mxu1 %v4240_v2 }
 0x250   : > { %3105 = vmatpush3.bf16.msra.mxu0 %v3848_v55 }
 0x251   : > { %3106 = vmatprep.subr.bf16.mxu0 %v4240_v2  ;;  %3129 = vmatpush3.bf16.msra.mxu1 %v3923_v63 }
 0x252   : > { %3130 = vmatprep.subr.bf16.mxu1 %v4240_v2 }
 0x254   : > { %3108 = vmatpush3.bf16.msra.mxu0 %v3855_v56 }
 0x255   : > { %3132 = vmatpush3.bf16.msra.mxu1 %v3930_v0  ;;  %3133 = vmatprep.subr.bf16.mxu0 %v4240_v2 }
 0x256   : > { %3158 = vmatprep.subr.bf16.mxu1 %v3639_v10 }
 0x257   : > { %2664 = vmatmul.mubr.f32.vlgmr.msra.gmra.mrb[8].mxu0 %v3502_v17 }
 0x258   : > { %3135 = vmatpush3.bf16.msra.mxu0 %v3658_v25  ;;  %2733 = vmatprep.mubr.msk.f32.mxu0 %vm3537_vm0, %v4239_v13 }
 0x259   : > { %3136 = vmatprep.subr.bf16.mxu0 %v4240_v2 }
 0x25c   : > { %3138 = vmatpush3.bf16.msra.mxu0 %v3675_v29 }
 0x25d   : > { %3139 = vmatprep.subr.bf16.mxu0 %v4240_v2 }
 0x260   : > { %3141 = vmatpush3.bf16.msra.mxu0 %v3697_v32 }
 0x261   : > { %3142 = vmatprep.subr.bf16.mxu0 %v4240_v2 }
 0x264   : > { %3144 = vmatpush3.bf16.msra.mxu0 %v3718_v35 }
 0x265   : > { %3145 = vmatprep.subr.bf16.mxu0 %v4240_v2 }
 0x268   : > { %3147 = vmatpush3.bf16.msra.mxu0 %v3737_v38 }
 0x269   : > { %3148 = vmatprep.subr.bf16.mxu0 %v4240_v2 }
 0x26c   : > { %3150 = vmatpush3.bf16.msra.mxu0 %v3756_v41 }
 0x26d   : > { %3151 = vmatprep.subr.bf16.mxu0 %v4240_v2 }
 0x270   : > { %3153 = vmatpush3.bf16.msra.mxu0 %v3775_v44 }
 0x271   : > { %3154 = vmatprep.subr.bf16.mxu0 %v4240_v2 }
 0x274   : > { %3156 = vmatpush3.bf16.msra.mxu0 %v3794_v47 }
 0x275   : > { %3189 = vmatprep.subr.bf16.mxu0 %v4240_v2 }
 0x30a   : > { %v1189_v18 = vpop.f32.mrb[6].mxu0  ;;  %v1259_v19 = vpop.f32.mrb[6].mxu1 }
 0x30b   : > { %v1260_v22 = vadd.f32 %v1259_v19, %v3953_v9  ;;  %v2630_v20 = vpop.f32.mrb[7].mxu0  ;;  %v1261_v23 = vpop.f32.mrb[7].mxu1  ;;  %v1190_v19 = vadd.f32 %v3964_v12, %v1189_v18 }
 0x30c   : > { %v1262_v26 = vadd.f32 %v1261_v23, %v3955_v11 }
 0x30d   : > { %v1334_v6 = vadd.f32 %v1260_v22, %v4241_v1  ;;  %v1373_v23 = vrot.slane %v1190_v19, 6  ;;  %v4244_v19 = vld [vmem:[#allocation8_spill] sm:$0xff] }
 0x30e   : > { %v1337_v15 = vadd.f32 %v1335_v48, %v1262_v26  ;;  %v1356_v26 = vrot.slane %v4241_v1, 4 }
 0x310   : > { %v1339_v3 = vcombine.low %v1337_v15, %v1337_v15 }
 0x312   : > { %v1346_v8 = vrot.slane %v1339_v3, %v3646_v21 }
 0x314   : > { %v1348_v5 = vsel %vm1012_vm2, %v1334_v6, %v1346_v8 }
 0x315   : > { %v2185_v7 = vmul.f32 -1.442695, %v1348_v5 }
 0x317   : > { %3503 = vpow2.f32 %v2185_v7 }
 0x321   : > { %v3504_v14 = vpop.eup %3503 }
 0x322   : > { %v1352_v17 = vadd.f32 1.0, %v3504_v14 }
 0x324   : > { %3505 = vrcp.f32 %v1352_v17 }
 0x32a   : > { %v1330_v20 = vpop.f32.mrb[8].mxu0 }
 0x32b   : > { %v2665_v9 = vpop.f32.mrb[9].mxu0  ;;  %v1331_v11 = vadd.f32 %v1330_v20, %v3966_v16 }
 0x32e   : > { %v3506_v47 = vpop.eup %3505 }
 0x32f   : > { %v1355_v22 = vmul.f32 %v3506_v47, %v1331_v11  ;;  %v1375_v48 = vmul.f32 %v3506_v47, %v1373_v23  ;;  %v1360_v5 = vsub.f32 1.0, %v3506_v47  ;;  %v4245_v23 = vld [vmem:[#allocation5_spill] sm:$0xff] }
 0x331   : > { %v1358_v15 = vadd.f32 %v1356_v26, %v1355_v22 }
 0x333   : > { %3507 = vtanh.f32 %v1358_v15 }
 0x33d   : > { %v3508_v6 = vpop.eup %3507 }
 0x33e   : > { %v1362_v3 = vcombine.low %v3508_v6, %v3508_v6 }
 0x340   : > { %v1369_v8 = vrot.slane %v1362_v3, %v3646_v21 }
 0x342   : > { %v1371_v7 = vmul.f32 %v1369_v8, %v1360_v5 }
 0x344   : > { %v1376_v14 = vadd.f32 %v1375_v48, %v1371_v7 }
 0x346   : > { %v1378_v18 = vrot.slane %v1376_v14, 2 }
 0x348   : > { %2699 = vmatmul.mubr.f32.vlgmr.msra.gmra.mrb[8].mxu1 %v1378_v18 }
 0x349   : > { %3160 = vmatpush1.bf16.msra.mxu1 %v3653_v24  ;;  %1587 = vmatprep.mubr.f32.mxu1 %v4239_v13 }
 0x34a   : > { %3162 = vmatprep.subr.bf16.mxu1 %v3663_v27 }
 0x34d   : > { %3164 = vmatpush1.bf16.msra.mxu1 %v3670_v28 }
 0x34e   : > { %3166 = vmatprep.subr.bf16.mxu1 %v3682_v30 }
 0x351   : > { %3168 = vmatpush1.bf16.msra.mxu1 %v3690_v31 }
 0x352   : > { %3170 = vmatprep.subr.bf16.mxu1 %v3704_v33 }
 0x355   : > { %3172 = vmatpush1.bf16.msra.mxu1 %v3711_v34 }
 0x356   : > { %3174 = vmatprep.subr.bf16.mxu1 %v3723_v36 }
 0x359   : > { %3176 = vmatpush1.bf16.msra.mxu1 %v3730_v37 }
 0x35a   : > { %3178 = vmatprep.subr.bf16.mxu1 %v3742_v39 }
 0x35d   : > { %3180 = vmatpush1.bf16.msra.mxu1 %v3749_v40 }
 0x35e   : > { %3182 = vmatprep.subr.bf16.mxu1 %v3761_v42 }
 0x361   : > { %3184 = vmatpush1.bf16.msra.mxu1 %v3768_v43 }
 0x362   : > { %3186 = vmatprep.subr.bf16.mxu1 %v3780_v45 }
 0x365   : > { %3188 = vmatpush1.bf16.msra.mxu1 %v3787_v46 }
 0x366   : > { %3213 = vmatprep.subr.bf16.mxu1 %v4240_v2 }
 0x41b   : > { %v1446_v47 = vpop.f32.mrb[8].mxu1 }
 0x41c   : > { %v1447_v9 = vadd.f32 %v3991_v4, %v1446_v47  ;;  %v2700_v11 = vpop.f32.mrb[9].mxu1 }
 0x41e   : > { %3509 = vtanh.f32 %v1447_v9 }
 0x428   : > { %v3510_v1 = vpop.eup %3509 }
 0x429   : > { %2186 = vst [vmem:[%s3608_s22 + $0x2] sm:$0x3] %v3510_v1  ;;  %2734 = vmatmul.mubr.f32.vlgmr.msra.gmra.mrb[10].mxu0 %v3510_v1  ;;  %1588 = vmatmul.mubr.f32.vlgmr.msra.gmra.mrb[10].mxu1 %v3510_v1 }
 0x42a   : > { %3191 = vmatpush3.bf16.msra.mxu0 %v3801_v49  ;;  %2768 = vmatprep.mubr.msk.f32.mxu0 %vm3537_vm0, %v4239_v13 }
 0x42b   : > { %3192 = vmatprep.subr.bf16.mxu0 %v4240_v2  ;;  %3215 = vmatpush3.bf16.msra.mxu1 %v3881_v57 }
 0x42c   : > { %3216 = vmatprep.subr.bf16.mxu1 %v4240_v2  ;;  %2803 = vmatprep.mubr.msk.f32.mxu1 %vm3537_vm0, %v4239_v13 }
 0x42e   : > { %3194 = vmatpush3.bf16.msra.mxu0 %v3809_v50 }
 0x42f   : > { %3195 = vmatprep.subr.bf16.mxu0 %v4240_v2  ;;  %3218 = vmatpush3.bf16.msra.mxu1 %v3888_v58 }
 0x430   : > { %3219 = vmatprep.subr.bf16.mxu1 %v4240_v2 }
 0x432   : > { %3197 = vmatpush3.bf16.msra.mxu0 %v3820_v51 }
 0x433   : > { %3198 = vmatprep.subr.bf16.mxu0 %v4240_v2  ;;  %3221 = vmatpush3.bf16.msra.mxu1 %v3895_v59 }
 0x434   : > { %3222 = vmatprep.subr.bf16.mxu1 %v4240_v2 }
 0x436   : > { %3200 = vmatpush3.bf16.msra.mxu0 %v3827_v52 }
 0x437   : > { %3201 = vmatprep.subr.bf16.mxu0 %v4240_v2  ;;  %3224 = vmatpush3.bf16.msra.mxu1 %v3902_v60 }
 0x438   : > { %3225 = vmatprep.subr.bf16.mxu1 %v4240_v2 }
 0x43a   : > { %3203 = vmatpush3.bf16.msra.mxu0 %v3834_v53 }
 0x43b   : > { %3204 = vmatprep.subr.bf16.mxu0 %v4240_v2  ;;  %3227 = vmatpush3.bf16.msra.mxu1 %v3909_v61 }
 0x43c   : > { %3228 = vmatprep.subr.bf16.mxu1 %v4240_v2 }
 0x43e   : > { %3206 = vmatpush3.bf16.msra.mxu0 %v3841_v54 }
 0x43f   : > { %3207 = vmatprep.subr.bf16.mxu0 %v4240_v2  ;;  %3230 = vmatpush3.bf16.msra.mxu1 %v3916_v62 }
 0x440   : > { %3231 = vmatprep.subr.bf16.mxu1 %v4240_v2 }
 0x442   : > { %3209 = vmatpush3.bf16.msra.mxu0 %v3848_v55 }
 0x443   : > { %3210 = vmatprep.subr.bf16.mxu0 %v4240_v2  ;;  %3233 = vmatpush3.bf16.msra.mxu1 %v3923_v63 }
 0x444   : > { %3234 = vmatprep.subr.bf16.mxu1 %v4240_v2 }
 0x446   : > { %3212 = vmatpush3.bf16.msra.mxu0 %v3855_v56 }
 0x447   : > { %3236 = vmatpush3.bf16.msra.mxu1 %v3930_v0  ;;  %3237 = vmatprep.subr.bf16.mxu0 %v4240_v2 }
 0x448   : > { %3262 = vmatprep.subr.bf16.mxu1 %v3639_v10  ;;  %v4242_v10 = vld [vmem:[#allocation3_spill] sm:$0xff] }
 0x449   : > { %2769 = vmatmul.mubr.f32.vlgmr.msra.gmra.mrb[12].mxu0 %v3510_v1  ;;  %v1686_v1 = vrot.slane %v4245_v23, 4 }
 0x44a   : > { %3239 = vmatpush3.bf16.msra.mxu0 %v3658_v25  ;;  %2838 = vmatprep.mubr.msk.f32.mxu0 %vm3537_vm0, %v4239_v13 }
 0x44b   : > { %3240 = vmatprep.subr.bf16.mxu0 %v4240_v2 }
 0x44e   : > { %3242 = vmatpush3.bf16.msra.mxu0 %v3675_v29 }
 0x44f   : > { %3243 = vmatprep.subr.bf16.mxu0 %v4240_v2 }
 0x452   : > { %3245 = vmatpush3.bf16.msra.mxu0 %v3697_v32  ;;  %v4243_v32 = vld [vmem:[#allocation7_spill] sm:$0xff] }
 0x453   : > { %3246 = vmatprep.subr.bf16.mxu0 %v4240_v2 }
 0x456   : > { %3248 = vmatpush3.bf16.msra.mxu0 %v3718_v35 }
 0x457   : > { %3249 = vmatprep.subr.bf16.mxu0 %v4240_v2 }
 0x45a   : > { %3251 = vmatpush3.bf16.msra.mxu0 %v3737_v38 }
 0x45b   : > { %3252 = vmatprep.subr.bf16.mxu0 %v4240_v2 }
 0x45e   : > { %3254 = vmatpush3.bf16.msra.mxu0 %v3756_v41  ;;  %v1665_v41 = vrot.slane %v4245_v23, 2 }
 0x45f   : > { %3255 = vmatprep.subr.bf16.mxu0 %v4240_v2 }
 0x462   : > { %3257 = vmatpush3.bf16.msra.mxu0 %v3775_v44 }
 0x463   : > { %3258 = vmatprep.subr.bf16.mxu0 %v4240_v2 }
 0x466   : > { %3260 = vmatpush3.bf16.msra.mxu0 %v4242_v10 }
 0x467   : > { %3293 = vmatprep.subr.bf16.mxu0 %v4240_v2 }
 0x4fc   : > { %v1519_v25 = vpop.f32.mrb[10].mxu0  ;;  %v1589_v29 = vpop.f32.mrb[10].mxu1 }
 0x4fd   : > { %v1590_v35 = vadd.f32 %v1589_v29, %v4243_v32  ;;  %v2735_v17 = vpop.f32.mrb[11].mxu0  ;;  %v1591_v38 = vpop.f32.mrb[11].mxu1  ;;  %v1520_v5 = vadd.f32 %v3964_v12, %v1519_v25 }
 0x4fe   : > { %v1592_v20 = vadd.f32 %v1591_v38, %v4244_v19 }
 0x4ff   : > { %v1664_v22 = vadd.f32 %v1590_v35, %v4245_v23  ;;  %v1703_v18 = vrot.slane %v1520_v5, 6 }
 0x500   : > { %v1667_v26 = vadd.f32 %v1665_v41, %v1592_v20 }
 0x502   : > { %v1669_v44 = vcombine.low %v1667_v26, %v1667_v26 }
 0x504   : > { %v1676_v48 = vrot.slane %v1669_v44, %v3646_v21 }
 0x506   : > { %v1678_v15 = vsel %vm1012_vm2, %v1664_v22, %v1676_v48 }
 0x507   : > { %v2187_v6 = vmul.f32 -1.442695, %v1678_v15 }
 0x509   : > { %3511 = vpow2.f32 %v2187_v6 }
 0x513   : > { %v3512_v3 = vpop.eup %3511 }
 0x514   : > { %v1682_v8 = vadd.f32 1.0, %v3512_v3 }
 0x516   : > { %3513 = vrcp.f32 %v1682_v8 }
 0x51c   : > { %v1660_v7 = vpop.f32.mrb[12].mxu0 }
 0x51d   : > { %v2770_v14 = vpop.f32.mrb[13].mxu0  ;;  %v1661_v47 = vadd.f32 %v1660_v7, %v3966_v16 }
 0x520   : > { %v3514_v9 = vpop.eup %3513 }
 0x521   : > { %v1685_v11 = vmul.f32 %v3514_v9, %v1661_v47  ;;  %v1705_v10 = vmul.f32 %v3514_v9, %v1703_v18  ;;  %v1690_v20 = vsub.f32 1.0, %v3514_v9 }
 0x523   : > { %v1688_v29 = vadd.f32 %v1686_v1, %v1685_v11 }
 0x525   : > { %3515 = vtanh.f32 %v1688_v29 }
 0x52f   : > { %v3516_v35 = vpop.eup %3515 }
 0x530   : > { %v1692_v17 = vcombine.low %v3516_v35, %v3516_v35 }
 0x532   : > { %v1699_v38 = vrot.slane %v1692_v17, %v3646_v21 }
 0x534   : > { %v1701_v41 = vmul.f32 %v1699_v38, %v1690_v20 }
 0x536   : > { %v1706_v22 = vadd.f32 %v1705_v10, %v1701_v41 }
 0x538   : > { %v1708_v25 = vrot.slane %v1706_v22, 2 }
 0x53a   : > { %2804 = vmatmul.mubr.f32.vlgmr.msra.gmra.mrb[12].mxu1 %v1708_v25 }
 0x53b   : > { %3264 = vmatpush1.bf16.msra.mxu1 %v3653_v24  ;;  %1917 = vmatprep.mubr.f32.mxu1 %v4239_v13 }
 0x53c   : > { %3266 = vmatprep.subr.bf16.mxu1 %v3663_v27 }
 0x53f   : > { %3268 = vmatpush1.bf16.msra.mxu1 %v3670_v28 }
 0x540   : > { %3270 = vmatprep.subr.bf16.mxu1 %v3682_v30 }
 0x543   : > { %3272 = vmatpush1.bf16.msra.mxu1 %v3690_v31 }
 0x544   : > { %3274 = vmatprep.subr.bf16.mxu1 %v3704_v33 }
 0x547   : > { %3276 = vmatpush1.bf16.msra.mxu1 %v3711_v34 }
 0x548   : > { %3278 = vmatprep.subr.bf16.mxu1 %v3723_v36 }
 0x54b   : > { %3280 = vmatpush1.bf16.msra.mxu1 %v3730_v37 }
 0x54c   : > { %3282 = vmatprep.subr.bf16.mxu1 %v3742_v39 }
 0x54f   : > { %3284 = vmatpush1.bf16.msra.mxu1 %v3749_v40  ;;  %v4246_v40 = vld [vmem:[#allocation6_spill] sm:$0xff] }
 0x550   : > { %3286 = vmatprep.subr.bf16.mxu1 %v3761_v42  ;;  %v1995_v42 = vrot.slane %v4246_v40, 2 }
 0x553   : > { %3288 = vmatpush1.bf16.msra.mxu1 %v3768_v43 }
 0x554   : > { %3290 = vmatprep.subr.bf16.mxu1 %v3780_v45 }
 0x557   : > { %3292 = vmatpush1.bf16.msra.mxu1 %v3787_v46 }
 0x558   : > { %3317 = vmatprep.subr.bf16.mxu1 %v4240_v2 }
 0x60d   : > { %v1776_v24 = vpop.f32.mrb[12].mxu1 }
 0x60e   : > { %v1777_v27 = vadd.f32 %v3991_v4, %v1776_v24  ;;  %v2805_v28 = vpop.f32.mrb[13].mxu1 }
 0x610   : > { %3517 = vtanh.f32 %v1777_v27 }
 0x61a   : > { %v3518_v30 = vpop.eup %3517 }
 0x61b   : > { %2188 = vst [vmem:[%s3608_s22 + $0x4] sm:$0x3] %v3518_v30  ;;  %2839 = vmatmul.mubr.f32.vlgmr.msra.gmra.mrb[14].mxu0 %v3518_v30  ;;  %1918 = vmatmul.mubr.f32.vlgmr.msra.gmra.mrb[14].mxu1 %v3518_v30 }
 0x61c   : > { %3295 = vmatpush3.bf16.msra.mxu0 %v3801_v49  ;;  %2873 = vmatprep.mubr.msk.f32.mxu0 %vm3537_vm0, %v4239_v13 }
 0x61d   : > { %3296 = vmatprep.subr.bf16.mxu0 %v4240_v2  ;;  %3319 = vmatpush3.bf16.msra.mxu1 %v3881_v57 }
 0x61e   : > { %3320 = vmatprep.subr.bf16.mxu1 %v4240_v2  ;;  %2908 = vmatprep.mubr.msk.f32.mxu1 %vm3537_vm0, %v4239_v13 }
 0x620   : > { %3298 = vmatpush3.bf16.msra.mxu0 %v3809_v50 }
 0x621   : > { %3299 = vmatprep.subr.bf16.mxu0 %v4240_v2  ;;  %3322 = vmatpush3.bf16.msra.mxu1 %v3888_v58 }
 0x622   : > { %3323 = vmatprep.subr.bf16.mxu1 %v4240_v2 }
 0x624   : > { %3301 = vmatpush3.bf16.msra.mxu0 %v3820_v51 }
 0x625   : > { %3302 = vmatprep.subr.bf16.mxu0 %v4240_v2  ;;  %3325 = vmatpush3.bf16.msra.mxu1 %v3895_v59 }
 0x626   : > { %3326 = vmatprep.subr.bf16.mxu1 %v4240_v2 }
 0x628   : > { %3304 = vmatpush3.bf16.msra.mxu0 %v3827_v52 }
 0x629   : > { %3305 = vmatprep.subr.bf16.mxu0 %v4240_v2  ;;  %3328 = vmatpush3.bf16.msra.mxu1 %v3902_v60 }
 0x62a   : > { %3329 = vmatprep.subr.bf16.mxu1 %v4240_v2 }
 0x62c   : > { %3307 = vmatpush3.bf16.msra.mxu0 %v3834_v53 }
 0x62d   : > { %3308 = vmatprep.subr.bf16.mxu0 %v4240_v2  ;;  %3331 = vmatpush3.bf16.msra.mxu1 %v3909_v61  ;;  %v2016_v61 = vrot.slane %v4246_v40, 4 }
 0x62e   : > { %3332 = vmatprep.subr.bf16.mxu1 %v4240_v2 }
 0x630   : > { %3310 = vmatpush3.bf16.msra.mxu0 %v3841_v54 }
 0x631   : > { %3311 = vmatprep.subr.bf16.mxu0 %v4240_v2  ;;  %3334 = vmatpush3.bf16.msra.mxu1 %v3916_v62 }
 0x632   : > { %3335 = vmatprep.subr.bf16.mxu1 %v4240_v2 }
 0x634   : > { %3313 = vmatpush3.bf16.msra.mxu0 %v3848_v55 }
 0x635   : > { %3314 = vmatprep.subr.bf16.mxu0 %v4240_v2  ;;  %3337 = vmatpush3.bf16.msra.mxu1 %v3923_v63 }
 0x636   : > { %3338 = vmatprep.subr.bf16.mxu1 %v4240_v2 }
 0x638   : > { %3316 = vmatpush3.bf16.msra.mxu0 %v3855_v56 }
 0x639   : > { %3340 = vmatpush3.bf16.msra.mxu1 %v3930_v0 }
 0x63b   : > { %2874 = vmatmul.mubr.f32.vlgmr.msra.gmra.mrb[16].mxu0 %v3518_v30 }
 0x6ee   : > { %v1849_v31 = vpop.f32.mrb[14].mxu0  ;;  %v1919_v33 = vpop.f32.mrb[14].mxu1 }
 0x6ef   : > { %v1920_v34 = vadd.f32 %v1919_v33, %v4243_v32  ;;  %v2840_v36 = vpop.f32.mrb[15].mxu0  ;;  %v1921_v37 = vpop.f32.mrb[15].mxu1  ;;  %v1850_v54 = vadd.f32 %v3964_v12, %v1849_v31 }
 0x6f0   : > { %v1922_v39 = vadd.f32 %v1921_v37, %v4244_v19 }
 0x6f1   : > { %v1994_v43 = vadd.f32 %v1920_v34, %v4246_v40  ;;  %v2033_v57 = vrot.slane %v1850_v54, 6 }
 0x6f2   : > { %v1997_v45 = vadd.f32 %v1995_v42, %v1922_v39 }
 0x6f4   : > { %v1999_v46 = vcombine.low %v1997_v45, %v1997_v45 }
 0x6f6   : > { %v2006_v49 = vrot.slane %v1999_v46, %v3646_v21 }
 0x6f8   : > { %v2008_v50 = vsel %vm1012_vm2, %v1994_v43, %v2006_v49 }
 0x6f9   : > { %v2189_v51 = vmul.f32 -1.442695, %v2008_v50 }
 0x6fb   : > { %3519 = vpow2.f32 %v2189_v51 }
 0x705   : > { %v3520_v52 = vpop.eup %3519 }
 0x706   : > { %v2012_v53 = vadd.f32 1.0, %v3520_v52 }
 0x708   : > { %3521 = vrcp.f32 %v2012_v53 }
 0x70e   : > { %v1990_v55 = vpop.f32.mrb[16].mxu0 }
 0x70f   : > { %v2875_v56 = vpop.f32.mrb[17].mxu0  ;;  %v1991_v58 = vadd.f32 %v1990_v55, %v3966_v16 }
 0x712   : > { %v3522_v59 = vpop.eup %3521 }
 0x713   : > { %v2015_v60 = vmul.f32 %v3522_v59, %v1991_v58  ;;  %v2035_v62 = vmul.f32 %v3522_v59, %v2033_v57  ;;  %v2020_v32 = vsub.f32 1.0, %v3522_v59 }
 0x715   : > { %v2018_v63 = vadd.f32 %v2016_v61, %v2015_v60 }
 0x717   : > { %3523 = vtanh.f32 %v2018_v63 }
 0x721   : > { %v3524_v0 = vpop.eup %3523 }
 0x722   : > { %v2022_v13 = vcombine.low %v3524_v0, %v3524_v0 }
 0x724   : > { %v2029_v2 = vrot.slane %v2022_v13, %v3646_v21 }
 0x726   : > { %v2031_v19 = vmul.f32 %v2029_v2, %v2020_v32 }
 0x728   : > { %v2036_v12 = vadd.f32 %v2035_v62, %v2031_v19 }
 0x72a   : > { %v2038_v23 = vrot.slane %v2036_v12, 2 }
 0x72c   : > { %2909 = vmatmul.mubr.f32.vlgmr.msra.gmra.mrb[16].mxu1 %v2038_v23 }
 0x7ff   : > { %v2106_v26 = vpop.f32.mrb[16].mxu1 }
 0x800   : > { %v2107_v16 = vadd.f32 %v3991_v4, %v2106_v26  ;;  %v2910_v44 = vpop.f32.mrb[17].mxu1 }
 0x802   : > { %3525 = vtanh.f32 %v2107_v16 }
 0x80c   : > { %v3526_v48 = vpop.eup %3525 }
 0x80d   : > { %2190 = vst [vmem:[%s3608_s22 + $0x6] sm:$0x3] %v3526_v48  ;;  %2113 = vst [vmem:[#allocation2] sm:$0x3] %v3526_v48 }
 0x80e PF: > { %s20_s13 = sadd.s32 1, %s3533_s13  }
 0x80f   : > { %p17_p5 = scmp.ge.s32.totalorder %s20_s13, 4  }
 0x811   :  { %19 = sbr.rel (!%p17_p5) target bundleno = 1 (0x1), region = 97 }

</bundles_post_ra>
